<compile_context>
chip_gen: v6e
topology: v6e:2x2x1
jax: 0.10.0
libtpu: 0.0.40
codegen_flags: <defaults>
</compile_context>

<pallas_src>
import functools

import jax
import jax.numpy as jnp
import numpy as np
from jax import lax
from jax.experimental import pallas as pl
from jax.experimental.pallas import tpu as pltpu

# deterministic "init" of the module's constructor args
L2_WEIGHT = 1.0
COSINE_WEIGHT = 0.5
CONTRASTIVE_WEIGHT = 0.25
TEMPERATURE = 1.0
EPS = 1e-8  # torch cosine_similarity eps


# ---------------------------------------------------------------------------
# Prologue: normalize to bf16 + per-row (diagonal) l2 / cosine terms.
# ---------------------------------------------------------------------------
def _normalize_kernel(pred_ref, tgt_ref, pred_n_ref, tgt_n_ref,
                      l2_ref, cos_ref, *, eps):
    p = pred_ref[...]                                    # [TBp, D] f32
    t = tgt_ref[...]

    p2 = jnp.sum(p * p, axis=1, keepdims=True)           # [TBp, 1]
    t2 = jnp.sum(t * t, axis=1, keepdims=True)
    # rsqrt(max(n2, eps^2)) == 1 / max(norm, eps): per-row rsqrt + VPU muls
    # instead of TB*D element-wise divides on the EUP.
    inv_p = lax.rsqrt(jnp.maximum(p2, eps * eps))
    inv_t = lax.rsqrt(jnp.maximum(t2, eps * eps))

    pred_n_ref[...] = (p * inv_p).astype(jnp.bfloat16)
    tgt_n_ref[...] = (t * inv_t).astype(jnp.bfloat16)

    diff = p - t                                         # direct (p - t)^2:
    l2_ref[...] = jnp.sum(diff * diff, axis=1, keepdims=True)  # no cancellation
    pt = jnp.sum(p * t, axis=1, keepdims=True)
    cos_ref[...] = 1.0 - 0.5 * (pt * inv_p * inv_t)      # == (1-cos)*0.5 + 0.5


# ---------------------------------------------------------------------------
# Main kernel: BxB contrastive logits, per-row-block partial outputs.
# ---------------------------------------------------------------------------
def _contrastive_kernel(pred_n_ref, tgt_n_ref,
                        row_den_ref, diag_ref, col_part_ref,
                        *, block_rows, inv_temperature, resident):
    ri = pl.program_id(0)      # target row block (rows of the sim matrix)
    ci = pl.program_id(1)      # prediction row block (cols of the sim matrix)

    tgt_n = tgt_n_ref[...]                               # [TB, D] bf16
    if resident:
        start = pl.multiple_of(ci * block_rows, block_rows)
        pred_n = pred_n_ref[pl.ds(start, block_rows), :]   # slice resident panel
    else:
        pred_n = pred_n_ref[...]

    # sim[i, j] = cos(tgt_i, pred_j); contract over D directly (no transpose),
    # bf16 x bf16 on the MXU with f32 accumulation.
    sim = lax.dot_general(tgt_n, pred_n, (((1,), (1,)), ((), ())),
                          preferred_element_type=jnp.float32)  # [TB, TB]

    # Diagonal block: CE numerator taken from the SAME sim that feeds the
    # denominators (no f32/bf16 numerator-denominator mismatch).
    @pl.when(ci == ri)
    def _diag():
        r = lax.broadcasted_iota(jnp.int32, (block_rows, block_rows), 0)
        c = lax.broadcasted_iota(jnp.int32, (block_rows, block_rows), 1)
        diag = jnp.sum(jnp.where(r == c, sim, 0.0), axis=1, keepdims=True)
        diag_ref[...] = (diag - 1.0) * inv_temperature

    # logits = (sim - 1)/T <= 0 for the baked-in temperature -> max-free LSE.
    # TODO(synk): restore max-subtraction if TEMPERATURE is ever made tiny.
    e = jnp.exp((sim - 1.0) * inv_temperature)            # [TB, TB] f32

    # Per-target-row exp-sums, accumulated across ci in the resident output
    # block (ci is the "arbitrary" inner grid axis).
    row_sum = jnp.sum(e, axis=1, keepdims=True)           # [TB, 1]

    @pl.when(ci == 0)
    def _row_init():
        row_den_ref[...] = row_sum

    @pl.when(ci != 0)
    def _row_acc():
        row_den_ref[...] += row_sum

    # Per-prediction-column partial exp-sums: each (ri, ci) owns its own
    # lane-dense (8, TB) slab (col_sum broadcast over sublanes), so the ri
    # axis stays race-free / "parallel" for v7x; the JAX epilogue sums over ri.
    col_sum = jnp.sum(e, axis=0, keepdims=True)            # [1, TB]
    col_part_ref[...] = jnp.broadcast_to(
        col_sum.reshape(1, 1, block_rows), (1, 8, block_rows))


def balanced_contrastive_loss(prediction, target, *, block_rows=None,
                              resident_prediction=None):
    """prediction, target: [B, D] float32. Returns (loss, loss_dict)."""
    B, D = prediction.shape
    assert target.shape == (B, D)

    # MXU-friendly tiles: 256 rows when possible, else 128; tiny / odd batches
    # fall back to one full-batch block.
    if block_rows is None:
        if B % 256 == 0:
            block_rows = 256
        elif B % 128 == 0:
            block_rows = 128
        else:
            block_rows = B   # TODO(synk): pad-and-mask instead for large odd B
    assert B % block_rows == 0, "block_rows must divide the batch"
    assert block_rows == B or block_rows % 128 == 0, (
        "tiles must be lane-dense (multiple of 128 rows) or cover the batch")
    n_blk = B // block_rows

    # ---- prologue: one-shot normalization + per-row l2 / cosine ----
    pro_rows = block_rows
    for cand in (256, 128, 64, 32, 16):
        if cand <= block_rows and B % cand == 0:
            pro_rows = cand
            if cand * D * 40 <= 12 * 1024 * 1024:   # dbl-buffered f32+bf16 tiles
                break
    pro_grid = B // pro_rows

    pred_n, tgt_n, l2_rows, cos_rows = pl.pallas_call(
        functools.partial(_normalize_kernel, eps=EPS),
        out_shape=(
            jax.ShapeDtypeStruct((B, D), jnp.bfloat16),
            jax.ShapeDtypeStruct((B, D), jnp.bfloat16),
            jax.ShapeDtypeStruct((B, 1), jnp.float32),
            jax.ShapeDtypeStruct((B, 1), jnp.float32),
        ),
        grid_spec=pltpu.PrefetchScalarGridSpec(
            num_scalar_prefetch=0,
            grid=(pro_grid,),
            in_specs=[pl.BlockSpec((pro_rows, D), lambda i: (i, 0)),
                      pl.BlockSpec((pro_rows, D), lambda i: (i, 0))],
            out_specs=[pl.BlockSpec((pro_rows, D), lambda i: (i, 0)),
                       pl.BlockSpec((pro_rows, D), lambda i: (i, 0)),
                       pl.BlockSpec((pro_rows, 1), lambda i: (i, 0)),
                       pl.BlockSpec((pro_rows, 1), lambda i: (i, 0))],
        ),
        compiler_params=pltpu.CompilerParams(
            dimension_semantics=("parallel",)),
    )(prediction, target)

    # ---- main kernel: contrastive part ----
    if resident_prediction is None:
        # full bf16 prediction panel (double-buffered by the pipeline) +
        # streamed bf16 target tile + sim/e intermediates; keep well under the
        # smallest default scoped-VMEM budget (v5e: 16 MiB default).
        resident_bytes = (2 * B * D * 2 + 2 * block_rows * D * 2
                          + 3 * block_rows * block_rows * 4)
        resident_prediction = resident_bytes <= 24 * 1024 * 1024

    if resident_prediction:
        # fetched from HBM once (constant block index), sliced per ci in-kernel
        pred_spec = pl.BlockSpec((B, D), lambda ri, ci: (0, 0))
    else:
        # TODO(synk): sweep pipeline_mode=pl.Buffered(2..4) here on v5e if the
        # streamed path ever dominates.
        pred_spec = pl.BlockSpec((block_rows, D), lambda ri, ci: (ci, 0))

    kernel = functools.partial(_contrastive_kernel, block_rows=block_rows,
                               inv_temperature=1.0 / TEMPERATURE,
                               resident=resident_prediction)

    cost = pl.CostEstimate(
        flops=2 * B * B * D,
        transcendentals=B * B,
        bytes_accessed=(B * D * 2 * (1 if resident_prediction else n_blk)
                        + B * D * 2 + (2 * B + n_blk * 8 * B) * 4),
    )

    est_vmem = (2 * ((B if resident_prediction else block_rows) * D * 2)
                + 2 * block_rows * D * 2
                + 3 * block_rows * block_rows * 4 + (4 << 20))
    vmem_limit = min(max(est_vmem, 32 << 20), 48 << 20)  # <= v7x 64 MiB physical

    row_den, diag_logits, col_part = pl.pallas_call(
        kernel,
        out_shape=(
            jax.ShapeDtypeStruct((B, 1), jnp.float32),         # row exp-sums
            jax.ShapeDtypeStruct((B, 1), jnp.float32),         # diag logits
            jax.ShapeDtypeStruct((n_blk, 8, B), jnp.float32),  # col partials
        ),
        grid_spec=pltpu.PrefetchScalarGridSpec(
            num_scalar_prefetch=0,
            grid=(n_blk, n_blk),
            in_specs=[pred_spec,
                      pl.BlockSpec((block_rows, D), lambda ri, ci: (ri, 0))],
            out_specs=[
                pl.BlockSpec((block_rows, 1), lambda ri, ci: (ri, 0)),
                pl.BlockSpec((block_rows, 1), lambda ri, ci: (ri, 0)),
                pl.BlockSpec((1, 8, block_rows), lambda ri, ci: (ri, 0, ci)),
            ],
        ),
        compiler_params=pltpu.CompilerParams(
            # row blocks are independent (partial outputs) -> "parallel" lets
            # v7x's two TensorCores split them; ci carries the row-denominator
            # accumulation -> "arbitrary".
            dimension_semantics=("parallel", "arbitrary"),
            vmem_limit_bytes=vmem_limit,
        ),
        cost_estimate=cost,
    )(pred_n, tgt_n)

    # ---- tiny O(B) epilogue (pure JAX): combine the per-block partials ----
    inv_b = 1.0 / B
    l2_loss = jnp.sum(l2_rows) * inv_b
    cosine_loss = jnp.sum(cos_rows) * inv_b
    diag = diag_logits[:, 0]                              # [B]
    col_den = jnp.sum(col_part[:, 0, :], axis=0)          # [B]
    ce_rows = jnp.sum(jnp.log(row_den[:, 0]) - diag) * inv_b
    ce_cols = jnp.sum(jnp.log(col_den) - diag) * inv_b
    contrastive_loss = 0.5 * (ce_rows + ce_cols)
    loss = (l2_loss * L2_WEIGHT + cosine_loss * COSINE_WEIGHT
            + contrastive_loss * CONTRASTIVE_WEIGHT)
    loss_dict = {"loss": loss, "l2_loss": l2_loss,
                 "cosine_loss": cosine_loss,
                 "contrastive_loss": contrastive_loss}
    return loss, loss_dict


def _reference(prediction, target):
    """Pure-JAX f32 reference mirroring the PyTorch forward."""
    p = prediction.astype(jnp.float32)
    t = target.astype(jnp.float32)
    l2 = jnp.mean(jnp.sum((p - t) ** 2, axis=1))
    pn = p / jnp.maximum(jnp.linalg.norm(p, axis=1, keepdims=True), EPS)
    tn = t / jnp.maximum(jnp.linalg.norm(t, axis=1, keepdims=True), EPS)
    cos = jnp.sum(pn * tn, axis=1)
    cosine = jnp.mean((1.0 - cos) * 0.5 + 0.5)
    sim = tn @ pn.T
    logits = (sim - 1.0) / TEMPERATURE
    labels = jnp.arange(p.shape[0])
    diag = logits[labels, labels]
    ce_r = jnp.mean(jax.nn.logsumexp(logits, axis=1) - diag)
    ce_c = jnp.mean(jax.nn.logsumexp(logits.T, axis=1) - diag)
    contrastive = 0.5 * (ce_r + ce_c)
    total = (l2 * L2_WEIGHT + cosine * COSINE_WEIGHT
             + contrastive * CONTRASTIVE_WEIGHT)
    return total, l2, cosine, contrastive


if __name__ == "__main__":
    # lane-aligned feature dim; batch large enough to exercise 128/256-row tiles
    B, D = 256, 128
    key = jax.random.PRNGKey(0)
    kp, kt = jax.random.split(key)
    prediction = jax.random.normal(kp, (B, D), dtype=jnp.float32)
    target = jax.random.normal(kt, (B, D), dtype=jnp.float32)

    ref_total, ref_l2, ref_cos, ref_con = _reference(prediction, target)

    # default config: 256-row tile, prediction panel VMEM-resident (grid 1x1)
    loss, loss_dict = balanced_contrastive_loss(prediction, target)
    loss = jax.block_until_ready(loss)

    # l2 / cosine are pure f32 in the prologue; contrastive uses a bf16 MXU
    # matmul, so it gets a slightly looser tolerance vs the f32 reference.
    np.testing.assert_allclose(np.asarray(loss_dict["l2_loss"]),
                               np.asarray(ref_l2), rtol=1e-4, atol=1e-4)
    np.testing.assert_allclose(np.asarray(loss_dict["cosine_loss"]),
                               np.asarray(ref_cos), rtol=1e-4, atol=1e-4)
    np.testing.assert_allclose(np.asarray(loss_dict["contrastive_loss"]),
                               np.asarray(ref_con), rtol=5e-3, atol=5e-3)
    np.testing.assert_allclose(np.asarray(loss), np.asarray(ref_total),
                               rtol=1e-3, atol=1e-2)

    # tiled path: 2x2 grid of 128-row blocks, resident prediction panel
    loss_t, _ = balanced_contrastive_loss(prediction, target, block_rows=128)
    loss_t = jax.block_until_ready(loss_t)
    np.testing.assert_allclose(np.asarray(loss_t), np.asarray(loss),
                               rtol=1e-4, atol=1e-4)

    # streamed-prediction fallback (what very large B*D would use)
    loss_s, _ = balanced_contrastive_loss(prediction, target, block_rows=128,
                                          resident_prediction=False)
    loss_s = jax.block_until_ready(loss_s)
    np.testing.assert_allclose(np.asarray(loss_s), np.asarray(loss),
                               rtol=1e-4, atol=1e-4)

    print("KERNEL_OK")
</pallas_src>

<mosaic_0001>
module attributes {stable_mosaic.version = 11 : i64} {
  func.func @_normalize_kernel(%arg0: i32, %arg1: memref<256x128xf32, #tpu.memory_space<vmem>>, %arg2: memref<256x128xf32, #tpu.memory_space<vmem>>, %arg3: memref<256x128xbf16, #tpu.memory_space<vmem>>, %arg4: memref<256x128xbf16, #tpu.memory_space<vmem>>, %arg5: memref<256x1xf32, #tpu.memory_space<vmem>>, %arg6: memref<256x1xf32, #tpu.memory_space<vmem>>) attributes {dimension_semantics = [#tpu.dimension_semantics<parallel>], iteration_bounds = array<i64: 1>, scalar_prefetch = 0 : i64, scratch_operands = 0 : i64, tpu.core_type = #tpu.core_type<tc>, window_params = [{transform_indices = @transform_0, window_bounds = array<i64: 256, 128>}, {transform_indices = @transform_1, window_bounds = array<i64: 256, 128>}, {transform_indices = @transform_2, window_bounds = array<i64: 256, 128>}, {transform_indices = @transform_3, window_bounds = array<i64: 256, 128>}, {transform_indices = @transform_4, window_bounds = array<i64: 256, 1>}, {transform_indices = @transform_5, window_bounds = array<i64: 256, 1>}]} {
    %c0 = arith.constant 0 : index
    %c0_0 = arith.constant 0 : index
    %0 = vector.load %arg1[%c0, %c0_0] : memref<256x128xf32, #tpu.memory_space<vmem>>, vector<256x128xf32>
    %c0_1 = arith.constant 0 : index
    %c0_2 = arith.constant 0 : index
    %1 = vector.load %arg2[%c0_1, %c0_2] : memref<256x128xf32, #tpu.memory_space<vmem>>, vector<256x128xf32>
    %2 = arith.mulf %0, %0 : vector<256x128xf32>
    %cst = arith.constant dense<0.000000e+00> : vector<256xf32>
    %3 = vector.multi_reduction <add>, %2, %cst [1] : vector<256x128xf32> to vector<256xf32>
    %4 = vector.shape_cast %3 : vector<256xf32> to vector<256x1xf32>
    %5 = arith.mulf %1, %1 : vector<256x128xf32>
    %cst_3 = arith.constant dense<0.000000e+00> : vector<256xf32>
    %6 = vector.multi_reduction <add>, %5, %cst_3 [1] : vector<256x128xf32> to vector<256xf32>
    %7 = vector.shape_cast %6 : vector<256xf32> to vector<256x1xf32>
    %cst_4 = arith.constant 1.000000e-16 : f32
    %8 = vector.broadcast %cst_4 : f32 to vector<256x1xf32>
    %9 = arith.maximumf %4, %8 : vector<256x1xf32>
    %10 = math.rsqrt %9 : vector<256x1xf32>
    %cst_5 = arith.constant 1.000000e-16 : f32
    %11 = vector.broadcast %cst_5 : f32 to vector<256x1xf32>
    %12 = arith.maximumf %7, %11 : vector<256x1xf32>
    %13 = math.rsqrt %12 : vector<256x1xf32>
    %14 = vector.broadcast %10 : vector<256x1xf32> to vector<256x128xf32>
    %15 = arith.mulf %0, %14 : vector<256x128xf32>
    %16 = arith.truncf %15 : vector<256x128xf32> to vector<256x128xbf16>
    %c0_6 = arith.constant 0 : index
    %c0_7 = arith.constant 0 : index
    %17 = vector.load %arg3[%c0_6, %c0_7] : memref<256x128xbf16, #tpu.memory_space<vmem>>, vector<256x128xbf16>
    tpu.vector_store %arg3[%c0_6, %c0_7], %16 {strides = array<i32>} : memref<256x128xbf16, #tpu.memory_space<vmem>>, vector<256x128xbf16>,
    %18 = vector.broadcast %13 : vector<256x1xf32> to vector<256x128xf32>
    %19 = arith.mulf %1, %18 : vector<256x128xf32>
    %20 = arith.truncf %19 : vector<256x128xf32> to vector<256x128xbf16>
    %c0_8 = arith.constant 0 : index
    %c0_9 = arith.constant 0 : index
    %21 = vector.load %arg4[%c0_8, %c0_9] : memref<256x128xbf16, #tpu.memory_space<vmem>>, vector<256x128xbf16>
    tpu.vector_store %arg4[%c0_8, %c0_9], %20 {strides = array<i32>} : memref<256x128xbf16, #tpu.memory_space<vmem>>, vector<256x128xbf16>,
    %22 = arith.subf %0, %1 : vector<256x128xf32>
    %23 = arith.mulf %22, %22 : vector<256x128xf32>
    %cst_10 = arith.constant dense<0.000000e+00> : vector<256xf32>
    %24 = vector.multi_reduction <add>, %23, %cst_10 [1] : vector<256x128xf32> to vector<256xf32>
    %25 = vector.shape_cast %24 : vector<256xf32> to vector<256x1xf32>
    %c0_11 = arith.constant 0 : index
    %c0_12 = arith.constant 0 : index
    %26 = vector.load %arg5[%c0_11, %c0_12] : memref<256x1xf32, #tpu.memory_space<vmem>>, vector<256x1xf32>
    tpu.vector_store %arg5[%c0_11, %c0_12], %25 {strides = array<i32>} : memref<256x1xf32, #tpu.memory_space<vmem>>, vector<256x1xf32>,
    %27 = arith.mulf %0, %1 : vector<256x128xf32>
    %cst_13 = arith.constant dense<0.000000e+00> : vector<256xf32>
    %28 = vector.multi_reduction <add>, %27, %cst_13 [1] : vector<256x128xf32> to vector<256xf32>
    %29 = vector.shape_cast %28 : vector<256xf32> to vector<256x1xf32>
    %30 = arith.mulf %29, %10 : vector<256x1xf32>
    %31 = arith.mulf %30, %13 : vector<256x1xf32>
    %cst_14 = arith.constant 5.000000e-01 : f32
    %32 = vector.broadcast %cst_14 : f32 to vector<256x1xf32>
    %33 = arith.mulf %32, %31 : vector<256x1xf32>
    %cst_15 = arith.constant 1.000000e+00 : f32
    %34 = vector.broadcast %cst_15 : f32 to vector<256x1xf32>
    %35 = arith.subf %34, %33 : vector<256x1xf32>
    %c0_16 = arith.constant 0 : index
    %c0_17 = arith.constant 0 : index
    %36 = vector.load %arg6[%c0_16, %c0_17] : memref<256x1xf32, #tpu.memory_space<vmem>>, vector<256x1xf32>
    tpu.vector_store %arg6[%c0_16, %c0_17], %35 {strides = array<i32>} : memref<256x1xf32, #tpu.memory_space<vmem>>, vector<256x1xf32>,
    return
  }
  func.func @transform_0(%arg0: i32) -> (i32, i32) {
    %c0_i32 = arith.constant 0 : i32
    %c0_i32_0 = arith.constant 0 : i32
    return %arg0, %c0_i32 : i32, i32
  }
  func.func @transform_1(%arg0: i32) -> (i32, i32) {
    %c0_i32 = arith.constant 0 : i32
    %c0_i32_0 = arith.constant 0 : i32
    return %arg0, %c0_i32 : i32, i32
  }
  func.func @transform_2(%arg0: i32) -> (i32, i32) {
    %c0_i32 = arith.constant 0 : i32
    %c0_i32_0 = arith.constant 0 : i32
    return %arg0, %c0_i32 : i32, i32
  }
  func.func @transform_3(%arg0: i32) -> (i32, i32) {
    %c0_i32 = arith.constant 0 : i32
    %c0_i32_0 = arith.constant 0 : i32
    return %arg0, %c0_i32 : i32, i32
  }
  func.func @transform_4(%arg0: i32) -> (i32, i32) {
    %c0_i32 = arith.constant 0 : i32
    %c0_i32_0 = arith.constant 0 : i32
    return %arg0, %c0_i32 : i32, i32
  }
  func.func @transform_5(%arg0: i32) -> (i32, i32) {
    %c0_i32 = arith.constant 0 : i32
    %c0_i32_0 = arith.constant 0 : i32
    return %arg0, %c0_i32 : i32, i32
  }
}

</mosaic_0001>

<bundles_post_ra>
// kernel: tpu_custom_call.1
= control target key start
LH: loop header
LB: loop body
LE: loop exit
PB: predicated region body
PF: predicated region fallthrough
CT: control target
= control target key end

     0   :  { %11 = vsyncpa [#allocation3], 0  ;;  %s2829_s0 = inlined_call_operand.hbm [shape: f32[256,128], index: 0, kind: input, shape index: {}]   ;;  %s2830_s1 = inlined_call_operand.hbm [shape: f32[256,128], index: 1, kind: input, shape index: {}]   ;;  %s2831_s2 = inlined_call_operand.hbm [shape: bf16[256,128], index: 2, kind: output, shape index: {0}]   ;;  %s2832_s3 = inlined_call_operand.hbm [shape: bf16[256,128], index: 3, kind: output, shape index: {1}]   ;;  %s2833_s4 = inlined_call_operand.vmem [shape: f32[256,1], index: 4, kind: output, shape index: {2}]   ;;  %s2834_s5 = inlined_call_operand.vmem [shape: f32[256,1], index: 5, kind: output, shape index: {3}]  }
   0x1   :  { %12 = vsyncpa [#allocation6], 0 }
   0x2   :  { %13 = vsyncpa [#allocation4], 0 }
   0x3   :  { %14 = vsyncpa [#allocation9], 0  ;;  %s1839_s18 = smov [#allocation2]  }
   0x4   :  { %s20_s19 = sshll.u32 %s1839_s18, 4  ;;  %s21_s19 = int_to_ptr.vmem [resolvable:$true] %s20_s19 }
   0x5   :  { %s1759_s20 = scalar_lea.vmem %s21_s19, 4096  ;;  %p1764_p1 = scmp.lt.s32.totalorder %s21_s19, %s21_s19 }
   0x6   :  { %p1760_p0 = scmp.ne.s32.totalorder %s21_s19, %s1759_s20  ;;  %p1765_p2 = scmp.lt.s32.totalorder %s1759_s20, %s1759_s20 }
   0x8   :  { %p1766_p3 = por %p1765_p2, %p1764_p1 }
   0xa   :  { %p1767_p4 = pnand %p1766_p3, %p1760_p0 }
   0xc   :  { %1770 = shalt.err (!%p1767_p4)
}
   0xd   :  { %s1840_s21 = smov 128   ;;  %s1841_s22 = smov 8  }
   0xe   :  { %26 = dma.hbm_to_vmem [thread:$0]  %s2829_s0, 4096, %s21_s19, [#allocation3], %s1840_s21, %s1840_s21, %s1841_s22  }
   0xf   :  { %s1842_s25 = smov [#allocation5]  }
  0x10   :  { %s32_s26 = sshll.u32 %s1842_s25, 4  ;;  %s33_s26 = int_to_ptr.vmem [resolvable:$true] %s32_s26 }
  0x11   :  { %s1779_s27 = scalar_lea.vmem %s33_s26, 4096  ;;  %p1784_p6 = scmp.lt.s32.totalorder %s33_s26, %s33_s26 }
  0x12   :  { %p1780_p5 = scmp.ne.s32.totalorder %s33_s26, %s1779_s27  ;;  %p1785_p7 = scmp.lt.s32.totalorder %s1779_s27, %s1779_s27 }
  0x14   :  { %p1786_p8 = por %p1785_p7, %p1784_p6 }
  0x16   :  { %p1787_p9 = pnand %p1786_p8, %p1780_p5 }
  0x18   :  { %1790 = shalt.err (!%p1787_p9)
}
  0x19   :  { %38 = dma.hbm_to_vmem [thread:$0]  %s2830_s1, 4096, %s33_s26, [#allocation6], %s1840_s21, %s1840_s21, %s1841_s22  }
  0x1a   :  { %1831 = dma.done.wait [#allocation3], 4096  }
  0x1b   :  { %1832 = vsyncadd [#allocation3], 4294963200 }
  0x1c   :  { %1833 = dma.done.wait [#allocation6], 4096  }
  0x1d   :  { %1834 = vsyncadd [#allocation6], 4294963200  ;;  %v1883_v0 = vld [vmem:[#allocation2 + $0x10] sm:$0xff]  ;;  %v1885_v1 = vld [vmem:[#allocation2] sm:$0xff]  ;;  %s1843_s0 = smov [#allocation7]   ;;  %vm941_vm0 = vcmask 7168  }
  0x1e   :  { %v1887_v2 = vld [vmem:[#allocation2 + $0x18] sm:$0xff]  ;;  %v111_v3 = vmul.f32 %v1883_v0, %v1883_v0  ;;  %v109_v4 = vmul.f32 %v1885_v1, %v1885_v1  ;;  %v1893_v5 = vld [vmem:[#allocation2 + $0x8] sm:$0xff]  ;;  %v1901_v9 = vld [vmem:[#allocation2 + $0x20] sm:$0xff]  ;;  %s1235_s1 = sshll.u32 %s1843_s0, 4  ;;  %s1236_s1 = int_to_ptr.vmem [resolvable:$true] %s1235_s1 }
  0x1f   :  { %v112_v6 = vmul.f32 %v1887_v2, %v1887_v2  ;;  %v110_v7 = vmul.f32 %v1893_v5, %v1893_v5  ;;  %v1899_v8 = vld [vmem:[#allocation2 + $0x28] sm:$0xff]  ;;  %v113_v11 = vmul.f32 %v1901_v9, %v1901_v9  ;;  %v1907_v12 = vld [vmem:[#allocation2 + $0x38] sm:$0xff]  ;;  %v1909_v13 = vld [vmem:[#allocation2 + $0x30] sm:$0xff]  ;;  %s1791_s30 = scalar_lea.vmem %s1236_s1, 2048  ;;  %p1796_p11 = scmp.lt.s32.totalorder %s1236_s1, %s1236_s1 }
  0x20   :  { %145 = vadd.xlane.f32.xlu1 %v111_v3  ;;  %141 = vadd.xlane.f32.xlu0 %v109_v4  ;;  %v114_v10 = vmul.f32 %v1899_v8, %v1899_v8  ;;  %v116_v14 = vmul.f32 %v1907_v12, %v1907_v12  ;;  %v115_v15 = vmul.f32 %v1909_v13, %v1909_v13  ;;  %v1915_v16 = vld [vmem:[#allocation2 + $0x48] sm:$0xff]  ;;  %v1917_v17 = vld [vmem:[#allocation2 + $0x40] sm:$0xff]  ;;  %v1923_v20 = vld [vmem:[#allocation2 + $0x58] sm:$0xff]  ;;  %p1792_p10 = scmp.ne.s32.totalorder %s1236_s1, %s1791_s30  ;;  %p1797_p12 = scmp.lt.s32.totalorder %s1791_s30, %s1791_s30 }
  0x21   :  { %v118_v18 = vmul.f32 %v1915_v16, %v1915_v16  ;;  %v117_v19 = vmul.f32 %v1917_v17, %v1917_v17  ;;  %v1925_v21 = vld [vmem:[#allocation2 + $0x50] sm:$0xff]  ;;  %v120_v22 = vmul.f32 %v1923_v20, %v1923_v20  ;;  %v1931_v24 = vld [vmem:[#allocation2 + $0x68] sm:$0xff]  ;;  %v1933_v25 = vld [vmem:[#allocation2 + $0x60] sm:$0xff] }
  0x22   :  { %v119_v23 = vmul.f32 %v1925_v21, %v1925_v21  ;;  %v122_v26 = vmul.f32 %v1931_v24, %v1931_v24  ;;  %v121_v27 = vmul.f32 %v1933_v25, %v1933_v25  ;;  %v1939_v28 = vld [vmem:[#allocation2 + $0x78] sm:$0xff]  ;;  %v1941_v29 = vld [vmem:[#allocation2 + $0x70] sm:$0xff]  ;;  %v1947_v32 = vld [vmem:[#allocation2 + $0x88] sm:$0xff]  ;;  %p1798_p13 = por %p1797_p12, %p1796_p11 }
  0x23   :  { %v124_v30 = vmul.f32 %v1939_v28, %v1939_v28  ;;  %v123_v31 = vmul.f32 %v1941_v29, %v1941_v29  ;;  %v1949_v33 = vld [vmem:[#allocation2 + $0x80] sm:$0xff]  ;;  %v126_v34 = vmul.f32 %v1947_v32, %v1947_v32  ;;  %v1955_v36 = vld [vmem:[#allocation2 + $0x98] sm:$0xff]  ;;  %v1957_v37 = vld [vmem:[#allocation2 + $0x90] sm:$0xff] }
  0x24   :  { %147 = vadd.xlane.f32.xlu1 %v112_v6  ;;  %143 = vadd.xlane.f32.xlu0 %v110_v7  ;;  %v125_v35 = vmul.f32 %v1949_v33, %v1949_v33  ;;  %v128_v38 = vmul.f32 %v1955_v36, %v1955_v36  ;;  %v127_v39 = vmul.f32 %v1957_v37, %v1957_v37  ;;  %v1963_v40 = vld [vmem:[#allocation2 + $0xa8] sm:$0xff]  ;;  %v1965_v41 = vld [vmem:[#allocation2 + $0xa0] sm:$0xff]  ;;  %v1971_v44 = vld [vmem:[#allocation2 + $0xb8] sm:$0xff]  ;;  %p1799_p0 = pnand %p1798_p13, %p1792_p10 }
  0x25   :  { %v130_v42 = vmul.f32 %v1963_v40, %v1963_v40  ;;  %v129_v43 = vmul.f32 %v1965_v41, %v1965_v41  ;;  %v1973_v45 = vld [vmem:[#allocation2 + $0xb0] sm:$0xff]  ;;  %v132_v46 = vmul.f32 %v1971_v44, %v1971_v44  ;;  %v1979_v48 = vld [vmem:[#allocation2 + $0xc8] sm:$0xff]  ;;  %v1981_v49 = vld [vmem:[#allocation2 + $0xc0] sm:$0xff] }
  0x26   :  { %v131_v47 = vmul.f32 %v1973_v45, %v1973_v45  ;;  %2887 = vst [vmem:[#allocation14_spill] sm:$0xff] %v1979_v48  ;;  %v134_v50 = vmul.f32 %v1979_v48, %v1979_v48  ;;  %v133_v51 = vmul.f32 %v1981_v49, %v1981_v49  ;;  %v1987_v52 = vld [vmem:[#allocation2 + $0xd8] sm:$0xff]  ;;  %v1989_v53 = vld [vmem:[#allocation2 + $0xd0] sm:$0xff]  ;;  %v1995_v56 = vld [vmem:[#allocation2 + $0xe8] sm:$0xff] }
  0x27   :  { %2888 = vst [vmem:[#allocation15_spill] sm:$0xff] %v1987_v52  ;;  %2889 = vst [vmem:[#allocation16_spill] sm:$0xff] %v1989_v53  ;;  %v136_v54 = vmul.f32 %v1987_v52, %v1987_v52  ;;  %v135_v55 = vmul.f32 %v1989_v53, %v1989_v53  ;;  %v1997_v57 = vld [vmem:[#allocation2 + $0xe0] sm:$0xff]  ;;  %v138_v58 = vmul.f32 %v1995_v56, %v1995_v56  ;;  %v2003_v60 = vld [vmem:[#allocation2 + $0xf8] sm:$0xff] }
  0x28   :  { %151 = vadd.xlane.f32.xlu1 %v114_v10  ;;  %149 = vadd.xlane.f32.xlu0 %v113_v11  ;;  %2890 = vst [vmem:[#allocation17_spill] sm:$0xff] %v1995_v56  ;;  %2891 = vst [vmem:[#allocation18_spill] sm:$0xff] %v1997_v57  ;;  %v137_v59 = vmul.f32 %v1997_v57, %v1997_v57  ;;  %v2005_v61 = vld [vmem:[#allocation2 + $0xf0] sm:$0xff]  ;;  %v140_v62 = vmul.f32 %v2003_v60, %v2003_v60  ;;  %v2011_v3 = vld [vmem:[#allocation5 + $0x8] sm:$0xff] }
  0x29   :  { %2892 = vst [vmem:[#allocation19_spill] sm:$0xff] %v2003_v60  ;;  %2893 = vst [vmem:[#allocation20_spill] sm:$0xff] %v2005_v61  ;;  %v139_v63 = vmul.f32 %v2005_v61, %v2005_v61  ;;  %v2013_v4 = vld [vmem:[#allocation5] sm:$0xff]  ;;  %v206_v6 = vmul.f32 %v2011_v3, %v2011_v3  ;;  %v2019_v10 = vld [vmem:[#allocation5 + $0x18] sm:$0xff] }
  0x2a   :  { %v205_v7 = vmul.f32 %v2013_v4, %v2013_v4  ;;  %v2021_v11 = vld [vmem:[#allocation5 + $0x10] sm:$0xff] }
  0x2c   :  { %155 = vadd.xlane.f32.xlu1 %v116_v14  ;;  %153 = vadd.xlane.f32.xlu0 %v115_v15  ;;  %v208_v14 = vmul.f32 %v2019_v10, %v2019_v10  ;;  %v207_v15 = vmul.f32 %v2021_v11, %v2021_v11 }
  0x30   :  { %159 = vadd.xlane.f32.xlu1 %v118_v18  ;;  %157 = vadd.xlane.f32.xlu0 %v117_v19  ;;  %v2027_v18 = vld [vmem:[#allocation5 + $0x28] sm:$0xff]  ;;  %v2029_v19 = vld [vmem:[#allocation5 + $0x20] sm:$0xff] }
  0x31   :  { %v817_v53 = vsub.f32 %v1901_v9, %v2029_v19 }
  0x34   :  { %163 = vadd.xlane.f32.xlu1 %v120_v22  ;;  %161 = vadd.xlane.f32.xlu0 %v119_v23  ;;  %v210_v22 = vmul.f32 %v2027_v18, %v2027_v18  ;;  %v209_v23 = vmul.f32 %v2029_v19, %v2029_v19 }
  0x38   :  { %167 = vadd.xlane.f32.xlu1 %v122_v26  ;;  %165 = vadd.xlane.f32.xlu0 %v121_v27  ;;  %v2035_v26 = vld [vmem:[#allocation5 + $0x38] sm:$0xff]  ;;  %v2037_v27 = vld [vmem:[#allocation5 + $0x30] sm:$0xff] }
  0x39   :  { %2894 = vst [vmem:[#allocation21_spill] sm:$0xff] %v2035_v26  ;;  %v820_v52 = vsub.f32 %v1907_v12, %v2035_v26 }
  0x3c   :  { %171 = vadd.xlane.f32.xlu1 %v124_v30  ;;  %169 = vadd.xlane.f32.xlu0 %v123_v31  ;;  %v212_v30 = vmul.f32 %v2035_v26, %v2035_v26  ;;  %v211_v31 = vmul.f32 %v2037_v27, %v2037_v27 }
  0x40   :  { %175 = vadd.xlane.f32.xlu1 %v126_v34  ;;  %173 = vadd.xlane.f32.xlu0 %v125_v35  ;;  %v2043_v34 = vld [vmem:[#allocation5 + $0x48] sm:$0xff]  ;;  %v2045_v35 = vld [vmem:[#allocation5 + $0x40] sm:$0xff] }
  0x41   :  { %2895 = vst [vmem:[#allocation22_spill] sm:$0xff] %v2043_v34  ;;  %2896 = vst [vmem:[#allocation23_spill] sm:$0xff] %v2045_v35 }
  0x44   :  { %179 = vadd.xlane.f32.xlu1 %v128_v38  ;;  %177 = vadd.xlane.f32.xlu0 %v127_v39  ;;  %v214_v38 = vmul.f32 %v2043_v34, %v2043_v34  ;;  %v213_v39 = vmul.f32 %v2045_v35, %v2045_v35 }
  0x48   :  { %183 = vadd.xlane.f32.xlu1 %v130_v42  ;;  %181 = vadd.xlane.f32.xlu0 %v129_v43  ;;  %v2051_v42 = vld [vmem:[#allocation5 + $0x58] sm:$0xff]  ;;  %v2053_v43 = vld [vmem:[#allocation5 + $0x50] sm:$0xff] }
  0x49   :  { %2897 = vst [vmem:[#allocation24_spill] sm:$0xff] %v2051_v42 }
  0x4c   :  { %187 = vadd.xlane.f32.xlu1 %v132_v46  ;;  %185 = vadd.xlane.f32.xlu0 %v131_v47  ;;  %v216_v46 = vmul.f32 %v2051_v42, %v2051_v42  ;;  %v215_v47 = vmul.f32 %v2053_v43, %v2053_v43 }
  0x50   :  { %191 = vadd.xlane.f32.xlu1 %v134_v50  ;;  %189 = vadd.xlane.f32.xlu0 %v133_v51  ;;  %v2059_v50 = vld [vmem:[#allocation5 + $0x68] sm:$0xff]  ;;  %v2061_v51 = vld [vmem:[#allocation5 + $0x60] sm:$0xff] }
  0x54   :  { %195 = vadd.xlane.f32.xlu1 %v136_v54  ;;  %193 = vadd.xlane.f32.xlu0 %v135_v55  ;;  %v218_v54 = vmul.f32 %v2059_v50, %v2059_v50  ;;  %v217_v55 = vmul.f32 %v2061_v51, %v2061_v51 }
  0x58   :  { %199 = vadd.xlane.f32.xlu1 %v138_v58  ;;  %197 = vadd.xlane.f32.xlu0 %v137_v59  ;;  %v2067_v58 = vld [vmem:[#allocation5 + $0x78] sm:$0xff]  ;;  %v2069_v59 = vld [vmem:[#allocation5 + $0x70] sm:$0xff] }
  0x5c   :  { %203 = vadd.xlane.f32.xlu1 %v140_v62  ;;  %201 = vadd.xlane.f32.xlu0 %v139_v63  ;;  %v220_v62 = vmul.f32 %v2067_v58, %v2067_v58  ;;  %v219_v63 = vmul.f32 %v2069_v59, %v2069_v59 }
  0x60   :  { %239 = vadd.xlane.f32.xlu1 %v206_v6  ;;  %237 = vadd.xlane.f32.xlu0 %v205_v7  ;;  %v2075_v6 = vld [vmem:[#allocation5 + $0x88] sm:$0xff]  ;;  %v2077_v7 = vld [vmem:[#allocation5 + $0x80] sm:$0xff] }
  0x61   :  { %2898 = vst [vmem:[#allocation25_spill] sm:$0xff] %v2075_v6 }
  0x64   :  { %243 = vadd.xlane.f32.xlu1 %v208_v14  ;;  %241 = vadd.xlane.f32.xlu0 %v207_v15  ;;  %v222_v14 = vmul.f32 %v2075_v6, %v2075_v6  ;;  %v221_v15 = vmul.f32 %v2077_v7, %v2077_v7 }
  0x68   :  { %247 = vadd.xlane.f32.xlu1 %v210_v22  ;;  %245 = vadd.xlane.f32.xlu0 %v209_v23  ;;  %v2083_v22 = vld [vmem:[#allocation5 + $0x98] sm:$0xff]  ;;  %v2085_v23 = vld [vmem:[#allocation5 + $0x90] sm:$0xff] }
  0x69   :  { %2899 = vst [vmem:[#allocation26_spill] sm:$0xff] %v2083_v22  ;;  %2900 = vst [vmem:[#allocation27_spill] sm:$0xff] %v2085_v23 }
  0x6c   :  { %251 = vadd.xlane.f32.xlu1 %v212_v30  ;;  %249 = vadd.xlane.f32.xlu0 %v211_v31  ;;  %v224_v30 = vmul.f32 %v2083_v22, %v2083_v22  ;;  %v223_v31 = vmul.f32 %v2085_v23, %v2085_v23 }
  0x70   :  { %255 = vadd.xlane.f32.xlu1 %v214_v38  ;;  %253 = vadd.xlane.f32.xlu0 %v213_v39  ;;  %v2091_v38 = vld [vmem:[#allocation5 + $0xa8] sm:$0xff]  ;;  %v2093_v39 = vld [vmem:[#allocation5 + $0xa0] sm:$0xff] }
  0x74   :  { %259 = vadd.xlane.f32.xlu1 %v216_v46  ;;  %257 = vadd.xlane.f32.xlu0 %v215_v47  ;;  %v226_v46 = vmul.f32 %v2091_v38, %v2091_v38  ;;  %v225_v47 = vmul.f32 %v2093_v39, %v2093_v39 }
  0x78   :  { %263 = vadd.xlane.f32.xlu1 %v218_v54  ;;  %261 = vadd.xlane.f32.xlu0 %v217_v55  ;;  %v2099_v54 = vld [vmem:[#allocation5 + $0xb8] sm:$0xff]  ;;  %v2101_v55 = vld [vmem:[#allocation5 + $0xb0] sm:$0xff] }
  0x7c   :  { %267 = vadd.xlane.f32.xlu1 %v220_v62  ;;  %265 = vadd.xlane.f32.xlu0 %v219_v63  ;;  %v228_v62 = vmul.f32 %v2099_v54, %v2099_v54  ;;  %v227_v63 = vmul.f32 %v2101_v55, %v2101_v55 }
  0x80   :  { %271 = vadd.xlane.f32.xlu1 %v222_v14  ;;  %269 = vadd.xlane.f32.xlu0 %v221_v15  ;;  %v2107_v14 = vld [vmem:[#allocation5 + $0xc8] sm:$0xff]  ;;  %v2109_v15 = vld [vmem:[#allocation5 + $0xc0] sm:$0xff] }
  0x81   :  { %2901 = vst [vmem:[#allocation28_spill] sm:$0xff] %v2107_v14 }
  0x84   :  { %275 = vadd.xlane.f32.xlu1 %v224_v30  ;;  %273 = vadd.xlane.f32.xlu0 %v223_v31  ;;  %v230_v30 = vmul.f32 %v2107_v14, %v2107_v14  ;;  %v229_v31 = vmul.f32 %v2109_v15, %v2109_v15 }
  0x88   :  { %279 = vadd.xlane.f32.xlu1 %v226_v46  ;;  %277 = vadd.xlane.f32.xlu0 %v225_v47  ;;  %v2115_v46 = vld [vmem:[#allocation5 + $0xd8] sm:$0xff]  ;;  %v2117_v47 = vld [vmem:[#allocation5 + $0xd0] sm:$0xff] }
  0x89   :  { %2902 = vst [vmem:[#allocation29_spill] sm:$0xff] %v2115_v46  ;;  %2903 = vst [vmem:[#allocation30_spill] sm:$0xff] %v2117_v47  ;;  %v232_v61 = vmul.f32 %v2115_v46, %v2115_v46  ;;  %v231_v60 = vmul.f32 %v2117_v47, %v2117_v47  ;;  %v814_v46 = vsub.f32 %v1893_v5, %v2011_v3 }
  0x8c   :  { %283 = vadd.xlane.f32.xlu1 %v228_v62  ;;  %281 = vadd.xlane.f32.xlu0 %v227_v63  ;;  %v2123_v62 = vld [vmem:[#allocation5 + $0xe8] sm:$0xff]  ;;  %v2125_v63 = vld [vmem:[#allocation5 + $0xe0] sm:$0xff] }
  0x8d   :  { %2904 = vst [vmem:[#allocation31_spill] sm:$0xff] %v2123_v62  ;;  %2905 = vst [vmem:[#allocation32_spill] sm:$0xff] %v2125_v63  ;;  %v234_v14 = vmul.f32 %v2123_v62, %v2123_v62  ;;  %v233_v57 = vmul.f32 %v2125_v63, %v2125_v63  ;;  %v816_v62 = vsub.f32 %v1887_v2, %v2019_v10 }
  0x8e   :  { %v846_v63 = vmul.f32 %v814_v46, %v814_v46 }
  0x90   :  { %287 = vadd.xlane.f32.xlu1 %v230_v30  ;;  %285 = vadd.xlane.f32.xlu0 %v229_v31  ;;  %v2131_v30 = vld [vmem:[#allocation5 + $0xf8] sm:$0xff]  ;;  %v2133_v31 = vld [vmem:[#allocation5 + $0xf0] sm:$0xff] }
  0x91   :  { %2906 = vst [vmem:[#allocation33_spill] sm:$0xff] %v2131_v30  ;;  %2907 = vst [vmem:[#allocation34_spill] sm:$0xff] %v2133_v31  ;;  %v236_v47 = vmul.f32 %v2131_v30, %v2131_v30 }
  0x94   :  { %291 = vadd.xlane.f32.xlu1 %v232_v61  ;;  %289 = vadd.xlane.f32.xlu0 %v231_v60  ;;  %v235_v60 = vmul.f32 %v2133_v31, %v2133_v31  ;;  %v813_v61 = vsub.f32 %v1885_v1, %v2013_v4  ;;  %v818_v31 = vsub.f32 %v1899_v8, %v2027_v18 }
  0x96   :  { %v845_v56 = vmul.f32 %v813_v61, %v813_v61  ;;  %v850_v46 = vmul.f32 %v818_v31, %v818_v31  ;;  %v821_v61 = vsub.f32 %v1917_v17, %v2045_v35 }
  0x98   :  { %295 = vadd.xlane.f32.xlu1 %v234_v14  ;;  %293 = vadd.xlane.f32.xlu0 %v233_v57  ;;  %v815_v14 = vsub.f32 %v1883_v0, %v2021_v11  ;;  %v848_v57 = vmul.f32 %v816_v62, %v816_v62  ;;  %v852_v62 = vmul.f32 %v820_v52, %v820_v52 }
  0x99   :  { %v853_v31 = vmul.f32 %v821_v61, %v821_v61 }
  0x9a   :  { %v847_v30 = vmul.f32 %v815_v14, %v815_v14 }
  0x9c   :  { %299 = vadd.xlane.f32.xlu1 %v236_v47  ;;  %297 = vadd.xlane.f32.xlu0 %v235_v60  ;;  %v849_v47 = vmul.f32 %v817_v53, %v817_v53  ;;  %v819_v60 = vsub.f32 %v1909_v13, %v2037_v27  ;;  %v824_v53 = vsub.f32 %v1923_v20, %v2051_v42 }
  0x9e   :  { %v856_v35 = vmul.f32 %v824_v53, %v824_v53 }
  0xa0   :  { %879 = vadd.xlane.f32.xlu1 %v846_v63  ;;  %877 = vadd.xlane.f32.xlu0 %v845_v56  ;;  %v822_v56 = vsub.f32 %v1915_v16, %v2043_v34  ;;  %v851_v63 = vmul.f32 %v819_v60, %v819_v60 }
  0xa4   :  { %883 = vadd.xlane.f32.xlu1 %v848_v57  ;;  %881 = vadd.xlane.f32.xlu0 %v847_v30  ;;  %v854_v30 = vmul.f32 %v822_v56, %v822_v56  ;;  %v825_v56 = vsub.f32 %v1933_v25, %v2061_v51 }
  0xa6   :  { %v857_v53 = vmul.f32 %v825_v56, %v825_v56 }
  0xa8   :  { %887 = vadd.xlane.f32.xlu1 %v850_v46  ;;  %885 = vadd.xlane.f32.xlu0 %v849_v47  ;;  %v823_v46 = vsub.f32 %v1925_v21, %v2053_v43 }
  0xa9   :  { %v146_v14 = vpop.xlane.xlu1 %145  ;;  %v142_v48 = vpop.xlane.xlu0 %141 }
  0xaa   :  { %v303_v26 = vmax.f32 %v146_v14, 1e-16  ;;  %v301_v57 = vmax.f32 %v142_v48, 1e-16  ;;  %v855_v48 = vmul.f32 %v823_v46, %v823_v46 }
  0xac   :  { %891 = vadd.xlane.f32.xlu1 %v852_v62  ;;  %889 = vadd.xlane.f32.xlu0 %v851_v63  ;;  %1598 = vrsqrt.f32 %v303_v26  ;;  %v826_v62 = vsub.f32 %v1931_v24, %v2059_v50  ;;  %v828_v26 = vsub.f32 %v1939_v28, %v2067_v58 }
  0xad   :  { %v148_v47 = vpop.xlane.xlu1 %147  ;;  %v144_v52 = vpop.xlane.xlu0 %143  ;;  %1600 = vrsqrt.f32 %v301_v57 }
  0xae   :  { %v304_v60 = vmax.f32 %v148_v47, 1e-16  ;;  %v302_v34 = vmax.f32 %v144_v52, 1e-16  ;;  %v858_v57 = vmul.f32 %v826_v62, %v826_v62  ;;  %v860_v52 = vmul.f32 %v828_v26, %v828_v26 }
  0xb0   :  { %1602 = vrsqrt.f32 %v304_v60  ;;  %895 = vadd.xlane.f32.xlu1 %v854_v30  ;;  %893 = vadd.xlane.f32.xlu0 %v853_v31  ;;  %v827_v30 = vsub.f32 %v1941_v29, %v2069_v59 }
  0xb1   :  { %1604 = vrsqrt.f32 %v302_v34  ;;  %v152_v63 = vpop.xlane.xlu1 %151  ;;  %v150_v61 = vpop.xlane.xlu0 %149 }
  0xb2   :  { %v306_v14 = vmax.f32 %v152_v63, 1e-16  ;;  %v305_v42 = vmax.f32 %v150_v61, 1e-16  ;;  %v859_v60 = vmul.f32 %v827_v30, %v827_v30  ;;  %v830_v63 = vsub.f32 %v1947_v32, %v2075_v6 }
  0xb3   :  { %v831_v30 = vsub.f32 %v1957_v37, %v2085_v23 }
  0xb4   :  { %1606 = vrsqrt.f32 %v306_v14  ;;  %899 = vadd.xlane.f32.xlu1 %v856_v35  ;;  %897 = vadd.xlane.f32.xlu0 %v855_v48  ;;  %v829_v35 = vsub.f32 %v1949_v33, %v2077_v7  ;;  %v832_v14 = vsub.f32 %v1955_v36, %v2083_v22 }
  0xb5   :  { %1608 = vrsqrt.f32 %v305_v42  ;;  %v156_v31 = vpop.xlane.xlu1 %155  ;;  %v154_v46 = vpop.xlane.xlu0 %153 }
  0xb6   :  { %v308_v47 = vmax.f32 %v156_v31, 1e-16  ;;  %v307_v34 = vmax.f32 %v154_v46, 1e-16 }
  0xb8   :  { %1610 = vrsqrt.f32 %v308_v47  ;;  %903 = vadd.xlane.f32.xlu1 %v858_v57  ;;  %901 = vadd.xlane.f32.xlu0 %v857_v53  ;;  %v862_v57 = vmul.f32 %v830_v63, %v830_v63  ;;  %v861_v53 = vmul.f32 %v829_v35, %v829_v35 }
  0xb9   :  { %1612 = vrsqrt.f32 %v307_v34  ;;  %v160_v48 = vpop.xlane.xlu1 %159  ;;  %v158_v62 = vpop.xlane.xlu0 %157 }
  0xba   :  { %v310_v56 = vmax.f32 %v160_v48, 1e-16  ;;  %v309_v42 = vmax.f32 %v158_v62, 1e-16  ;;  %v2175_v61 = vpop.eup %1598 }
  0xbb   :  { %2908 = vst [vmem:[#allocation35_spill] sm:$0xff] %v2175_v61  ;;  %v2179_v26 = vpop.eup %1600  ;;  %v431_v48 = vmul.f32 %v2175_v61, %v1883_v0  ;;  %v863_v61 = vmul.f32 %v831_v30, %v831_v30 }
  0xbc   :  { %2909 = vst [vmem:[#allocation36_spill] sm:$0xff] %v2179_v26  ;;  %1614 = vrsqrt.f32 %v310_v56  ;;  %907 = vadd.xlane.f32.xlu1 %v860_v52  ;;  %905 = vadd.xlane.f32.xlu0 %v859_v60  ;;  %v429_v63 = vmul.f32 %v2179_v26, %v1885_v1  ;;  %v864_v56 = vmul.f32 %v832_v14, %v832_v14 }
  0xbd   :  { %v2183_v31 = vpop.eup %1602  ;;  %1616 = vrsqrt.f32 %v309_v42  ;;  %v164_v46 = vpop.xlane.xlu1 %163  ;;  %v834_v42 = vsub.f32 %v1963_v40, %v2091_v38 }
  0xbe   :  { %2910 = vst [vmem:[#allocation37_spill] sm:$0xff] %v2183_v31  ;;  %v162_v47 = vpop.xlane.xlu0 %161  ;;  %v2185_v34 = vpop.eup %1604  ;;  %v432_v62 = vmul.f32 %v2183_v31, %v1887_v2  ;;  %v312_v52 = vmax.f32 %v164_v46, 1e-16  ;;  %v833_v31 = vsub.f32 %v1965_v41, %v2093_v39 }
  0xbf   :  { %v311_v60 = vmax.f32 %v162_v47, 1e-16  ;;  %v430_v35 = vmul.f32 %v2185_v34, %v1893_v5 }
  0xc0   :  { %v1408_v22 = vpack.c.bf16 %v432_v62, %v431_v48  ;;  %1618 = vrsqrt.f32 %v312_v52  ;;  %911 = vadd.xlane.f32.xlu1 %v862_v57  ;;  %909 = vadd.xlane.f32.xlu0 %v861_v53  ;;  %v866_v53 = vmul.f32 %v834_v42, %v834_v42  ;;  %v865_v30 = vmul.f32 %v833_v31, %v833_v31 }
  0xc1   :  { %v2199_v46 = vpop.eup %1606  ;;  %v1403_v47 = vpack.c.bf16 %v430_v35, %v429_v63  ;;  %1620 = vrsqrt.f32 %v311_v60  ;;  %v168_v26 = vpop.xlane.xlu1 %167  ;;  %v836_v52 = vsub.f32 %v1971_v44, %v2099_v54 }
  0xc2   :  { %2911 = vst [vmem:[#allocation38_spill] sm:$0xff] %v2199_v46  ;;  %v166_v6 = vpop.xlane.xlu0 %165  ;;  %v2201_v23 = vpop.eup %1608  ;;  %1560 = vst [vmem:[#allocation7 + $0x8] sm:$0xff] %v1408_v22   ;;  %v434_v14 = vmul.f32 %v2199_v46, %v1899_v8  ;;  %v314_v48 = vmax.f32 %v168_v26, 1e-16  ;;  %v835_v22 = vsub.f32 %v1973_v45, %v2101_v55 }
  0xc3   :  { %v313_v62 = vmax.f32 %v166_v6, 1e-16  ;;  %1404 = vst [vmem:[#allocation7] sm:$0xff] %v1403_v47   ;;  %v433_v57 = vmul.f32 %v2201_v23, %v1901_v9  ;;  %v868_v47 = vmul.f32 %v836_v52, %v836_v52 }
  0xc4   :  { %1622 = vrsqrt.f32 %v314_v48  ;;  %915 = vadd.xlane.f32.xlu1 %v864_v56  ;;  %913 = vadd.xlane.f32.xlu0 %v863_v61  ;;  %v867_v48 = vmul.f32 %v835_v22, %v835_v22 }
  0xc5   :  { %v2211_v60 = vpop.eup %1610  ;;  %v1413_v63 = vpack.c.bf16 %v434_v14, %v433_v57  ;;  %1624 = vrsqrt.f32 %v313_v62  ;;  %v172_v6 = vpop.xlane.xlu1 %171  ;;  %v837_v14 = vsub.f32 %v1981_v49, %v2109_v15 }
  0xc6   :  { %2912 = vst [vmem:[#allocation39_spill] sm:$0xff] %v2211_v60  ;;  %v170_v26 = vpop.xlane.xlu0 %169  ;;  %v2213_v35 = vpop.eup %1612  ;;  %v436_v42 = vmul.f32 %v2211_v60, %v1907_v12  ;;  %v316_v56 = vmax.f32 %v172_v6, 1e-16 }
  0xc7   :  { %v315_v61 = vmax.f32 %v170_v26, 1e-16  ;;  %1561 = vst [vmem:[#allocation7 + $0x10] sm:$0xff] %v1413_v63   ;;  %v435_v31 = vmul.f32 %v2213_v35, %v1909_v13  ;;  %v869_v52 = vmul.f32 %v837_v14, %v837_v14 }
  0xc8   :  { %1626 = vrsqrt.f32 %v316_v56  ;;  %919 = vadd.xlane.f32.xlu1 %v866_v53  ;;  %917 = vadd.xlane.f32.xlu0 %v865_v30  ;;  %v974_v30 = vmul.f32 %v2013_v4, %v1885_v1  ;;  %v976_v1 = vmul.f32 %v2021_v11, %v1883_v0 }
  0xc9   :  { %v2221_v62 = vpop.eup %1614  ;;  %v1418_v57 = vpack.c.bf16 %v436_v42, %v435_v31  ;;  %1628 = vrsqrt.f32 %v315_v61  ;;  %v176_v46 = vpop.xlane.xlu1 %175 }
  0xca   :  { %2913 = vst [vmem:[#allocation40_spill] sm:$0xff] %v2221_v62  ;;  %v174_v60 = vpop.xlane.xlu0 %173  ;;  %v2223_v6 = vpop.eup %1616  ;;  %v438_v63 = vmul.f32 %v2221_v62, %v1915_v16  ;;  %v318_v26 = vmax.f32 %v176_v46, 1e-16 }
  0xcb   :  { %v317_v56 = vmax.f32 %v174_v60, 1e-16  ;;  %1562 = vst [vmem:[#allocation7 + $0x18] sm:$0xff] %v1418_v57   ;;  %v437_v53 = vmul.f32 %v2223_v6, %v1917_v17 }
  0xcc   :  { %1630 = vrsqrt.f32 %v318_v26  ;;  %923 = vadd.xlane.f32.xlu1 %v868_v47  ;;  %921 = vadd.xlane.f32.xlu0 %v867_v48  ;;  %v975_v48 = vmul.f32 %v2011_v3, %v1893_v5  ;;  %v978_v5 = vmul.f32 %v2029_v19, %v1901_v9 }
  0xcd   :  { %v2231_v22 = vpop.eup %1618  ;;  %v1423_v42 = vpack.c.bf16 %v438_v63, %v437_v53  ;;  %1632 = vrsqrt.f32 %v317_v56  ;;  %v180_v61 = vpop.xlane.xlu1 %179 }
  0xce   :  { %v178_v31 = vpop.xlane.xlu0 %177  ;;  %v2233_v62 = vpop.eup %1620  ;;  %v440_v46 = vmul.f32 %v2231_v22, %v1923_v20  ;;  %v320_v60 = vmax.f32 %v180_v61, 1e-16 }
  0xcf   :  { %v319_v57 = vmax.f32 %v178_v31, 1e-16  ;;  %1563 = vst [vmem:[#allocation7 + $0x20] sm:$0xff] %v1423_v42   ;;  %v439_v47 = vmul.f32 %v2233_v62, %v1925_v21 }
  0xd0   :  { %1634 = vrsqrt.f32 %v320_v60  ;;  %1006 = vadd.xlane.f32.xlu1 %v974_v30  ;;  %925 = vadd.xlane.f32.xlu0 %v869_v52  ;;  %v977_v52 = vmul.f32 %v2019_v10, %v1887_v2  ;;  %v980_v2 = vmul.f32 %v2037_v27, %v1909_v13 }
  0xd1   :  { %v2243_v14 = vpop.eup %1622  ;;  %v1428_v63 = vpack.c.bf16 %v440_v46, %v439_v47  ;;  %1636 = vrsqrt.f32 %v319_v57  ;;  %v184_v26 = vpop.xlane.xlu1 %183 }
  0xd2   :  { %v182_v56 = vpop.xlane.xlu0 %181  ;;  %v2245_v53 = vpop.eup %1624  ;;  %v442_v42 = vmul.f32 %v2243_v14, %v1931_v24  ;;  %v322_v61 = vmax.f32 %v184_v26, 1e-16 }
  0xd3   :  { %v321_v30 = vmax.f32 %v182_v56, 1e-16  ;;  %1564 = vst [vmem:[#allocation7 + $0x28] sm:$0xff] %v1428_v63   ;;  %v441_v0 = vmul.f32 %v2245_v53, %v1933_v25 }
  0xd4   :  { %1638 = vrsqrt.f32 %v322_v61  ;;  %1010 = vadd.xlane.f32.xlu1 %v976_v1  ;;  %1008 = vadd.xlane.f32.xlu0 %v975_v48  ;;  %v979_v48 = vmul.f32 %v2027_v18, %v1899_v8  ;;  %v2914_v8 = vld [vmem:[#allocation23_spill] sm:$0xff] }
  0xd5   :  { %v2255_v31 = vpop.eup %1626  ;;  %v1433_v46 = vpack.c.bf16 %v442_v42, %v441_v0  ;;  %1640 = vrsqrt.f32 %v321_v30  ;;  %v188_v60 = vpop.xlane.xlu1 %187 }
  0xd6   :  { %v186_v57 = vpop.xlane.xlu0 %185  ;;  %v2257_v47 = vpop.eup %1628  ;;  %v444_v63 = vmul.f32 %v2255_v31, %v1939_v28  ;;  %v324_v26 = vmax.f32 %v188_v60, 1e-16 }
  0xd7   :  { %v323_v1 = vmax.f32 %v186_v57, 1e-16  ;;  %1565 = vst [vmem:[#allocation7 + $0x30] sm:$0xff] %v1433_v46   ;;  %v443_v9 = vmul.f32 %v2257_v47, %v1941_v29  ;;  %v2915_v57 = vld [vmem:[#allocation21_spill] sm:$0xff] }
  0xd8   :  { %1642 = vrsqrt.f32 %v324_v26  ;;  %1014 = vadd.xlane.f32.xlu1 %v978_v5  ;;  %1012 = vadd.xlane.f32.xlu0 %v977_v52  ;;  %v982_v52 = vmul.f32 %v2914_v8, %v1917_v17 }
  0xd9   :  { %v2267_v56 = vpop.eup %1630  ;;  %v1438_v42 = vpack.c.bf16 %v444_v63, %v443_v9  ;;  %1644 = vrsqrt.f32 %v323_v1  ;;  %v192_v61 = vpop.xlane.xlu1 %191  ;;  %v981_v63 = vmul.f32 %v2915_v57, %v1907_v12  ;;  %v984_v12 = vmul.f32 %v2053_v43, %v1925_v21 }
  0xda   :  { %v190_v30 = vpop.xlane.xlu0 %189  ;;  %v2269_v0 = vpop.eup %1632  ;;  %v446_v46 = vmul.f32 %v2267_v56, %v1947_v32  ;;  %v326_v60 = vmax.f32 %v192_v61, 1e-16 }
  0xdb   :  { %v325_v5 = vmax.f32 %v190_v30, 1e-16  ;;  %1566 = vst [vmem:[#allocation7 + $0x38] sm:$0xff] %v1438_v42   ;;  %v445_v13 = vmul.f32 %v2269_v0, %v1949_v33 }
  0xdc   :  { %1646 = vrsqrt.f32 %v326_v60  ;;  %1018 = vadd.xlane.f32.xlu1 %v980_v2  ;;  %1016 = vadd.xlane.f32.xlu0 %v979_v48  ;;  %v2917_v48 = vld [vmem:[#allocation22_spill] sm:$0xff] }
  0xdd   :  { %v2279_v26 = vpop.eup %1634  ;;  %v1443_v1 = vpack.c.bf16 %v446_v46, %v445_v13  ;;  %1648 = vrsqrt.f32 %v325_v5  ;;  %v196_v9 = vpop.xlane.xlu1 %195  ;;  %v983_v46 = vmul.f32 %v2917_v48, %v1915_v16  ;;  %v986_v16 = vmul.f32 %v2061_v51, %v1933_v25 }
  0xde   :  { %2916 = vst [vmem:[#allocation23_spill] sm:$0xff] %v2279_v26  ;;  %v194_v61 = vpop.xlane.xlu0 %193  ;;  %v2281_v30 = vpop.eup %1636  ;;  %v448_v42 = vmul.f32 %v2279_v26, %v1955_v36  ;;  %v328_v60 = vmax.f32 %v196_v9, 1e-16 }
  0xdf   :  { %v327_v2 = vmax.f32 %v194_v61, 1e-16  ;;  %1567 = vst [vmem:[#allocation7 + $0x40] sm:$0xff] %v1443_v1   ;;  %v447_v17 = vmul.f32 %v2281_v30, %v1957_v37 }
  0xe0   :  { %1650 = vrsqrt.f32 %v328_v60  ;;  %1022 = vadd.xlane.f32.xlu1 %v982_v52  ;;  %1020 = vadd.xlane.f32.xlu0 %v981_v63  ;;  %v2919_v63 = vld [vmem:[#allocation24_spill] sm:$0xff] }
  0xe1   :  { %v2291_v5 = vpop.eup %1638  ;;  %v1448_v13 = vpack.c.bf16 %v448_v42, %v447_v17  ;;  %1652 = vrsqrt.f32 %v327_v2  ;;  %v200_v26 = vpop.xlane.xlu1 %199  ;;  %v985_v42 = vmul.f32 %v2919_v63, %v1923_v20  ;;  %v988_v20 = vmul.f32 %v2069_v59, %v1941_v29 }
  0xe2   :  { %2918 = vst [vmem:[#allocation21_spill] sm:$0xff] %v2291_v5  ;;  %v198_v9 = vpop.xlane.xlu0 %197  ;;  %v2293_v61 = vpop.eup %1640  ;;  %v450_v1 = vmul.f32 %v2291_v5, %v1963_v40  ;;  %v330_v60 = vmax.f32 %v200_v26, 1e-16  ;;  %v989_v59 = vmul.f32 %v2067_v58, %v1939_v28  ;;  %v2926_v28 = vld [vmem:[#allocation27_spill] sm:$0xff] }
  0xe3   :  { %v329_v52 = vmax.f32 %v198_v9, 1e-16  ;;  %1568 = vst [vmem:[#allocation7 + $0x48] sm:$0xff] %v1448_v13   ;;  %v449_v21 = vmul.f32 %v2293_v61, %v1965_v41  ;;  %v992_v58 = vmul.f32 %v2926_v28, %v1957_v37 }
  0xe4   :  { %1654 = vrsqrt.f32 %v330_v60  ;;  %1026 = vadd.xlane.f32.xlu1 %v984_v12  ;;  %1024 = vadd.xlane.f32.xlu0 %v983_v46  ;;  %v987_v46 = vmul.f32 %v2059_v50, %v1931_v24  ;;  %v990_v24 = vmul.f32 %v2077_v7, %v1949_v33  ;;  %v2927_v7 = vld [vmem:[#allocation25_spill] sm:$0xff] }
  0xe5   :  { %v2303_v2 = vpop.eup %1642  ;;  %v1453_v17 = vpack.c.bf16 %v450_v1, %v449_v21  ;;  %1656 = vrsqrt.f32 %v329_v52  ;;  %v204_v5 = vpop.xlane.xlu1 %203 }
  0xe6   :  { %2920 = vst [vmem:[#allocation22_spill] sm:$0xff] %v2303_v2  ;;  %v202_v26 = vpop.xlane.xlu0 %201  ;;  %v2305_v9 = vpop.eup %1644  ;;  %v452_v13 = vmul.f32 %v2303_v2, %v1971_v44  ;;  %v332_v60 = vmax.f32 %v204_v5, 1e-16 }
  0xe7   :  { %v331_v12 = vmax.f32 %v202_v26, 1e-16  ;;  %1569 = vst [vmem:[#allocation7 + $0x50] sm:$0xff] %v1453_v17   ;;  %v451_v25 = vmul.f32 %v2305_v9, %v1973_v45  ;;  %v2922_v17 = vld [vmem:[#allocation14_spill] sm:$0xff] }
  0xe8   :  { %1658 = vrsqrt.f32 %v332_v60  ;;  %1030 = vadd.xlane.f32.xlu1 %v986_v16  ;;  %1028 = vadd.xlane.f32.xlu0 %v985_v42 }
  0xe9   :  { %v2315_v1 = vpop.eup %1646  ;;  %v1458_v52 = vpack.c.bf16 %v452_v13, %v451_v25  ;;  %1660 = vrsqrt.f32 %v331_v12  ;;  %v240_v21 = vpop.xlane.xlu1 %239 }
  0xea   :  { %2921 = vst [vmem:[#allocation24_spill] sm:$0xff] %v2315_v1  ;;  %v238_v5 = vpop.xlane.xlu0 %237  ;;  %v2317_v26 = vpop.eup %1648  ;;  %v454_v2 = vmul.f32 %v2315_v1, %v2922_v17  ;;  %v366_v60 = vmax.f32 %v240_v21, 1e-16 }
  0xeb   :  { %v365_v16 = vmax.f32 %v238_v5, 1e-16  ;;  %1570 = vst [vmem:[#allocation7 + $0x58] sm:$0xff] %v1458_v52   ;;  %v453_v29 = vmul.f32 %v2317_v26, %v1981_v49  ;;  %v2924_v52 = vld [vmem:[#allocation15_spill] sm:$0xff] }
  0xec   :  { %1662 = vrsqrt.f32 %v366_v60  ;;  %1034 = vadd.xlane.f32.xlu1 %v988_v20  ;;  %1032 = vadd.xlane.f32.xlu0 %v987_v46  ;;  %v2925_v46 = vld [vmem:[#allocation16_spill] sm:$0xff] }
  0xed   :  { %v2327_v42 = vpop.eup %1650  ;;  %v1463_v13 = vpack.c.bf16 %v454_v2, %v453_v29  ;;  %1664 = vrsqrt.f32 %v365_v16  ;;  %v244_v12 = vpop.xlane.xlu1 %243  ;;  %v991_v2 = vmul.f32 %v2927_v7, %v1947_v32  ;;  %v994_v32 = vmul.f32 %v2093_v39, %v1965_v41 }
  0xee   :  { %2923 = vst [vmem:[#allocation14_spill] sm:$0xff] %v2327_v42  ;;  %v242_v25 = vpop.xlane.xlu0 %241  ;;  %v2329_v21 = vpop.eup %1652  ;;  %v456_v5 = vmul.f32 %v2327_v42, %v2924_v52  ;;  %v368_v60 = vmax.f32 %v244_v12, 1e-16  ;;  %v995_v39 = vmul.f32 %v2091_v38, %v1963_v40  ;;  %v998_v40 = vmul.f32 %v2109_v15, %v1981_v49  ;;  %v2936_v15 = vld [vmem:[#allocation28_spill] sm:$0xff] }
  0xef   :  { %v367_v20 = vmax.f32 %v242_v25, 1e-16  ;;  %1571 = vst [vmem:[#allocation7 + $0x60] sm:$0xff] %v1463_v13   ;;  %v455_v33 = vmul.f32 %v2329_v21, %v2925_v46  ;;  %v2929_v13 = vld [vmem:[#allocation17_spill] sm:$0xff]  ;;  %v997_v38 = vmul.f32 %v2099_v54, %v1971_v44  ;;  %v2935_v44 = vld [vmem:[#allocation30_spill] sm:$0xff] }
  0xf0   :  { %1666 = vrsqrt.f32 %v368_v60  ;;  %1038 = vadd.xlane.f32.xlu1 %v990_v24  ;;  %1036 = vadd.xlane.f32.xlu0 %v989_v59  ;;  %v2930_v59 = vld [vmem:[#allocation18_spill] sm:$0xff]  ;;  %v1000_v54 = vmul.f32 %v2935_v44, %v2925_v46 }
  0xf1   :  { %v2339_v16 = vpop.eup %1654  ;;  %v1468_v29 = vpack.c.bf16 %v456_v5, %v455_v33  ;;  %1668 = vrsqrt.f32 %v367_v20  ;;  %v248_v42 = vpop.xlane.xlu1 %247  ;;  %v2931_v5 = vld [vmem:[#allocation26_spill] sm:$0xff] }
  0xf2   :  { %2928 = vst [vmem:[#allocation15_spill] sm:$0xff] %v2339_v16  ;;  %v246_v12 = vpop.xlane.xlu0 %245  ;;  %v2341_v25 = vpop.eup %1656  ;;  %v458_v1 = vmul.f32 %v2339_v16, %v2929_v13  ;;  %v370_v60 = vmax.f32 %v248_v42, 1e-16  ;;  %v993_v20 = vmul.f32 %v2931_v5, %v1955_v36  ;;  %v996_v36 = vmul.f32 %v2101_v55, %v1973_v45 }
  0xf3   :  { %v369_v24 = vmax.f32 %v246_v12, 1e-16  ;;  %1572 = vst [vmem:[#allocation7 + $0x68] sm:$0xff] %v1468_v29   ;;  %v457_v37 = vmul.f32 %v2341_v25, %v2930_v59  ;;  %v2933_v29 = vld [vmem:[#allocation19_spill] sm:$0xff] }
  0xf4   :  { %1670 = vrsqrt.f32 %v370_v60  ;;  %1042 = vadd.xlane.f32.xlu1 %v992_v58  ;;  %1040 = vadd.xlane.f32.xlu0 %v991_v2  ;;  %v2934_v2 = vld [vmem:[#allocation20_spill] sm:$0xff] }
  0xf5   :  { %v2351_v33 = vpop.eup %1658  ;;  %v1473_v28 = vpack.c.bf16 %v458_v1, %v457_v37  ;;  %1672 = vrsqrt.f32 %v369_v24  ;;  %v252_v7 = vpop.xlane.xlu1 %251 }
  0xf6   :  { %2932 = vst [vmem:[#allocation16_spill] sm:$0xff] %v2351_v33  ;;  %v250_v42 = vpop.xlane.xlu0 %249  ;;  %v2353_v12 = vpop.eup %1660  ;;  %v460_v16 = vmul.f32 %v2351_v33, %v2933_v29  ;;  %v372_v60 = vmax.f32 %v252_v7, 1e-16 }
  0xf7   :  { %v371_v58 = vmax.f32 %v250_v42, 1e-16  ;;  %1573 = vst [vmem:[#allocation7 + $0x70] sm:$0xff] %v1473_v28   ;;  %v459_v41 = vmul.f32 %v2353_v12, %v2934_v2 }
  0xf8   :  { %1674 = vrsqrt.f32 %v372_v60  ;;  %1046 = vadd.xlane.f32.xlu1 %v994_v32  ;;  %1044 = vadd.xlane.f32.xlu0 %v993_v20 }
  0xf9   :  { %v2363_v1 = vpop.eup %1662  ;;  %v1478_v24 = vpack.c.bf16 %v460_v16, %v459_v41  ;;  %1676 = vrsqrt.f32 %v371_v58  ;;  %v256_v37 = vpop.xlane.xlu1 %255  ;;  %v999_v41 = vmul.f32 %v2936_v15, %v2922_v17  ;;  %v2937_v17 = vld [vmem:[#allocation32_spill] sm:$0xff] }
  0xfa   :  { %v254_v5 = vpop.xlane.xlu0 %253  ;;  %v2365_v7 = vpop.eup %1664  ;;  %v622_v28 = vmul.f32 %v2363_v1, %v2011_v3  ;;  %v374_v42 = vmax.f32 %v256_v37, 1e-16 }
  0xfb   :  { %v373_v32 = vmax.f32 %v254_v5, 1e-16  ;;  %1574 = vst [vmem:[#allocation7 + $0x78] sm:$0xff] %v1478_v24   ;;  %v621_v45 = vmul.f32 %v2365_v7, %v2013_v4 }
  0xfc   :  { %1678 = vrsqrt.f32 %v374_v42  ;;  %1050 = vadd.xlane.f32.xlu1 %v996_v36  ;;  %1048 = vadd.xlane.f32.xlu0 %v995_v39  ;;  %v1002_v42 = vmul.f32 %v2937_v17, %v2930_v59 }
  0xfd   :  { %v2375_v55 = vpop.eup %1666  ;;  %v1483_v16 = vpack.c.bf16 %v622_v28, %v621_v45  ;;  %1680 = vrsqrt.f32 %v373_v32  ;;  %v260_v3 = vpop.xlane.xlu1 %259  ;;  %v2938_v32 = vld [vmem:[#allocation29_spill] sm:$0xff] }
  0xfe   :  { %v258_v20 = vpop.xlane.xlu0 %257  ;;  %v2377_v29 = vpop.eup %1668  ;;  %v624_v4 = vmul.f32 %v2375_v55, %v2019_v10  ;;  %v376_v60 = vmax.f32 %v260_v3, 1e-16  ;;  %v1001_v45 = vmul.f32 %v2938_v32, %v2924_v52 }
  0xff   :  { %v375_v58 = vmax.f32 %v258_v20, 1e-16  ;;  %1484 = vst [vmem:[#allocation8] sm:$0xff] %v1483_v16   ;;  %v623_v49 = vmul.f32 %v2377_v29, %v2021_v11 }
 0x100   :  { %1682 = vrsqrt.f32 %v376_v60  ;;  %1054 = vadd.xlane.f32.xlu1 %v998_v40  ;;  %1052 = vadd.xlane.f32.xlu0 %v997_v38  ;;  %v1726_v60 = vld [vmem:[#allocation2 + $0xc8] sm:$0xff] }
 0x101   :  { %v2387_v36 = vpop.eup %1670  ;;  %v1488_v39 = vpack.c.bf16 %v624_v4, %v623_v49  ;;  %1684 = vrsqrt.f32 %v375_v58  ;;  %v264_v10 = vpop.xlane.xlu1 %263  ;;  %v838_v52 = vsub.f32 %v1726_v60, %v2936_v15  ;;  %v2939_v58 = vld [vmem:[#allocation34_spill] sm:$0xff] }
 0x102   :  { %v262_v24 = vpop.xlane.xlu0 %261  ;;  %v2389_v37 = vpop.eup %1672  ;;  %v626_v11 = vmul.f32 %v2387_v36, %v2027_v18  ;;  %v378_v5 = vmax.f32 %v264_v10, 1e-16  ;;  %v1004_v49 = vmul.f32 %v2939_v58, %v2934_v2 }
 0x103   :  { %v377_v28 = vmax.f32 %v262_v24, 1e-16  ;;  %1575 = vst [vmem:[#allocation8 + $0x8] sm:$0xff] %v1488_v39   ;;  %v625_v46 = vmul.f32 %v2389_v37, %v2029_v19 }
 0x104   :  { %1686 = vrsqrt.f32 %v378_v5  ;;  %1058 = vadd.xlane.f32.xlu1 %v1000_v54  ;;  %1056 = vadd.xlane.f32.xlu0 %v999_v41  ;;  %v2940_v54 = vld [vmem:[#allocation31_spill] sm:$0xff] }
 0x105   :  { %v2399_v40 = vpop.eup %1674  ;;  %v1493_v38 = vpack.c.bf16 %v626_v11, %v625_v46  ;;  %1688 = vrsqrt.f32 %v377_v28  ;;  %v268_v18 = vpop.xlane.xlu1 %267  ;;  %v1003_v41 = vmul.f32 %v2940_v54, %v2929_v13  ;;  %v870_v28 = vmul.f32 %v838_v52, %v838_v52  ;;  %v1727_v13 = vld [vmem:[#allocation2 + $0xf8] sm:$0xff] }
 0x106   :  { %v266_v16 = vpop.xlane.xlu0 %265  ;;  %v2401_v3 = vpop.eup %1676  ;;  %v628_v19 = vmul.f32 %v2399_v40, %v2915_v57  ;;  %v380_v20 = vmax.f32 %v268_v18, 1e-16  ;;  %v2941_v46 = vld [vmem:[#allocation33_spill] sm:$0xff]  ;;  %v1729_v18 = vld [vmem:[#allocation2 + $0xd0] sm:$0xff] }
 0x107   :  { %v379_v4 = vmax.f32 %v266_v16, 1e-16  ;;  %1576 = vst [vmem:[#allocation8 + $0x10] sm:$0xff] %v1493_v38   ;;  %v627_v59 = vmul.f32 %v2401_v3, %v2037_v27  ;;  %v839_v16 = vsub.f32 %v1729_v18, %v2935_v44  ;;  %v1732_v18 = vld [vmem:[#allocation2 + $0xf0] sm:$0xff] }
 0x108   :  { %1690 = vrsqrt.f32 %v380_v20  ;;  %1062 = vadd.xlane.f32.xlu1 %v1002_v42  ;;  %1060 = vadd.xlane.f32.xlu0 %v1001_v45  ;;  %v1005_v42 = vmul.f32 %v1727_v13, %v2941_v46  ;;  %v1728_v45 = vld [vmem:[#allocation2 + $0xd8] sm:$0xff] }
 0x109   :  { %v2412_v39 = vpop.eup %1678  ;;  %v1498_v57 = vpack.c.bf16 %v628_v19, %v627_v59  ;;  %1692 = vrsqrt.f32 %v379_v4  ;;  %v272_v10 = vpop.xlane.xlu1 %271  ;;  %v840_v38 = vsub.f32 %v1728_v45, %v2938_v32 }
 0x10a   :  { %v270_v24 = vpop.xlane.xlu0 %269  ;;  %v2414_v11 = vpop.eup %1680  ;;  %v630_v27 = vmul.f32 %v2412_v39, %v2917_v48  ;;  %v382_v15 = vmax.f32 %v272_v10, 1e-16  ;;  %v1731_v10 = vld [vmem:[#allocation2 + $0xe0] sm:$0xff] }
 0x10b   :  { %v381_v5 = vmax.f32 %v270_v24, 1e-16  ;;  %1577 = vst [vmem:[#allocation8 + $0x18] sm:$0xff] %v1498_v57   ;;  %v629_v2 = vmul.f32 %v2414_v11, %v2914_v8  ;;  %v871_v57 = vmul.f32 %v839_v16, %v839_v16  ;;  %v841_v24 = vsub.f32 %v1731_v10, %v2937_v17 }
 0x10c   :  { %1694 = vrsqrt.f32 %v382_v15  ;;  %1066 = vadd.xlane.f32.xlu1 %v1004_v49  ;;  %1064 = vadd.xlane.f32.xlu0 %v1003_v41  ;;  %v1730_v49 = vld [vmem:[#allocation2 + $0xe8] sm:$0xff]  ;;  %v872_v41 = vmul.f32 %v840_v38, %v840_v38  ;;  %v844_v38 = vsub.f32 %v1727_v13, %v2941_v46  ;;  %v843_v16 = vsub.f32 %v1732_v18, %v2939_v58 }
 0x10d   :  { %v2423_v48 = vpop.eup %1682  ;;  %v1503_v19 = vpack.c.bf16 %v630_v27, %v629_v2  ;;  %1696 = vrsqrt.f32 %v381_v5  ;;  %v276_v20 = vpop.xlane.xlu1 %275  ;;  %v842_v44 = vsub.f32 %v1730_v49, %v2940_v54  ;;  %v873_v17 = vmul.f32 %v841_v24, %v841_v24  ;;  %v1734_v49 = vld [vmem:[#allocation5 + $0x70] sm:$0xff] }
 0x10e   :  { %v274_v4 = vpop.xlane.xlu0 %273  ;;  %v2425_v8 = vpop.eup %1684  ;;  %v632_v59 = vmul.f32 %v2423_v48, %v2919_v63  ;;  %v384_v60 = vmax.f32 %v276_v20, 1e-16  ;;  %v876_v58 = vmul.f32 %v844_v38, %v844_v38  ;;  %v875_v46 = vmul.f32 %v843_v16, %v843_v16  ;;  %v1737_v16 = vld [vmem:[#allocation5 + $0x98] sm:$0xff] }
 0x10f   :  { %v383_v52 = vmax.f32 %v274_v4, 1e-16  ;;  %1578 = vst [vmem:[#allocation8 + $0x20] sm:$0xff] %v1503_v19   ;;  %v631_v32 = vmul.f32 %v2425_v8, %v2053_v43 }
 0x110   :  { %1698 = vrsqrt.f32 %v384_v60  ;;  %927 = vadd.xlane.f32.xlu1 %v870_v28  ;;  %1068 = vadd.xlane.f32.xlu0 %v1005_v42  ;;  %v874_v42 = vmul.f32 %v842_v44, %v842_v44  ;;  %v1733_v60 = vld [vmem:[#allocation5 + $0x78] sm:$0xff] }
 0x111   :  { %v2433_v27 = vpop.eup %1686  ;;  %v1508_v63 = vpack.c.bf16 %v632_v59, %v631_v32  ;;  %1700 = vrsqrt.f32 %v383_v52  ;;  %v280_v15 = vpop.xlane.xlu1 %279 }
 0x112   :  { %v278_v5 = vpop.xlane.xlu0 %277  ;;  %v2435_v2 = vpop.eup %1688  ;;  %v634_v43 = vmul.f32 %v2433_v27, %v2059_v50  ;;  %v386_v54 = vmax.f32 %v280_v15, 1e-16 }
 0x113   :  { %v385_v45 = vmax.f32 %v278_v5, 1e-16  ;;  %1579 = vst [vmem:[#allocation8 + $0x28] sm:$0xff] %v1508_v63   ;;  %v633_v28 = vmul.f32 %v2435_v2, %v2061_v51  ;;  %v1735_v63 = vld [vmem:[#allocation5 + $0x88] sm:$0xff] }
 0x114   :  { %1702 = vrsqrt.f32 %v386_v54  ;;  %931 = vadd.xlane.f32.xlu1 %v872_v41  ;;  %929 = vadd.xlane.f32.xlu0 %v871_v57  ;;  %v1736_v54 = vld [vmem:[#allocation5 + $0x80] sm:$0xff] }
 0x115   :  { %v2443_v19 = vpop.eup %1690  ;;  %v1513_v20 = vpack.c.bf16 %v634_v43, %v633_v28  ;;  %1704 = vrsqrt.f32 %v385_v45  ;;  %v284_v50 = vpop.xlane.xlu1 %283 }
 0x116   :  { %v282_v4 = vpop.xlane.xlu0 %281  ;;  %v2445_v59 = vpop.eup %1692  ;;  %v636_v51 = vmul.f32 %v1733_v60, %v2443_v19  ;;  %v388_v52 = vmax.f32 %v284_v50, 1e-16  ;;  %v1738_v60 = vld [vmem:[#allocation5 + $0x90] sm:$0xff] }
 0x117   :  { %v387_v32 = vmax.f32 %v282_v4, 1e-16  ;;  %1580 = vst [vmem:[#allocation8 + $0x30] sm:$0xff] %v1513_v20   ;;  %v635_v13 = vmul.f32 %v1734_v49, %v2445_v59 }
 0x118   :  { %1706 = vrsqrt.f32 %v388_v52  ;;  %935 = vadd.xlane.f32.xlu1 %v874_v42  ;;  %933 = vadd.xlane.f32.xlu0 %v873_v17 }
 0x119   :  { %v2449_v44 = vpop.eup %1694  ;;  %v1518_v41 = vpack.c.bf16 %v636_v51, %v635_v13  ;;  %1708 = vrsqrt.f32 %v387_v32  ;;  %v288_v57 = vpop.xlane.xlu1 %287 }
 0x11a   :  { %v286_v10 = vpop.xlane.xlu0 %285  ;;  %v2451_v24 = vpop.eup %1696  ;;  %v638_v15 = vmul.f32 %v1735_v63, %v2449_v44  ;;  %v390_v5 = vmax.f32 %v288_v57, 1e-16  ;;  %v1740_v63 = vld [vmem:[#allocation5 + $0xa0] sm:$0xff] }
 0x11b   :  { %v389_v43 = vmax.f32 %v286_v10, 1e-16  ;;  %1581 = vst [vmem:[#allocation8 + $0x38] sm:$0xff] %v1518_v41   ;;  %v637_v45 = vmul.f32 %v1736_v54, %v2451_v24 }
 0x11c   :  { %1710 = vrsqrt.f32 %v390_v5  ;;  %939 = vadd.xlane.f32.xlu1 %v876_v58  ;;  %937 = vadd.xlane.f32.xlu0 %v875_v46  ;;  %v1739_v46 = vld [vmem:[#allocation5 + $0xa8] sm:$0xff] }
 0x11d   :  { %v2455_v28 = vpop.eup %1698  ;;  %v1523_v42 = vpack.c.bf16 %v638_v15, %v637_v45  ;;  %1712 = vrsqrt.f32 %v389_v43  ;;  %v292_v17 = vpop.xlane.xlu1 %291 }
 0x11e   :  { %v290_v38 = vpop.xlane.xlu0 %289  ;;  %v2457_v18 = vpop.eup %1700  ;;  %v640_v20 = vmul.f32 %v1737_v16, %v2455_v28  ;;  %v392_v50 = vmax.f32 %v292_v17, 1e-16  ;;  %v1741_v17 = vld [vmem:[#allocation5 + $0xb8] sm:$0xff] }
 0x11f   :  { %v391_v4 = vmax.f32 %v290_v38, 1e-16  ;;  %1582 = vst [vmem:[#allocation8 + $0x40] sm:$0xff] %v1523_v42   ;;  %v639_v51 = vmul.f32 %v1738_v60, %v2457_v18 }
 0x120   :  { %1714 = vrsqrt.f32 %v392_v50  ;;  %v1742_v50 = vld [vmem:[#allocation5 + $0xb0] sm:$0xff] }
 0x121   :  { %v2461_v52 = vpop.eup %1702  ;;  %v1528_v32 = vpack.c.bf16 %v640_v20, %v639_v51  ;;  %1716 = vrsqrt.f32 %v391_v4  ;;  %v296_v49 = vpop.xlane.xlu1 %295 }
 0x122   :  { %v294_v13 = vpop.xlane.xlu0 %293  ;;  %v2463_v58 = vpop.eup %1704  ;;  %v642_v41 = vmul.f32 %v1739_v46, %v2461_v52  ;;  %v394_v57 = vmax.f32 %v296_v49, 1e-16 }
 0x123   :  { %v393_v10 = vmax.f32 %v294_v13, 1e-16  ;;  %1583 = vst [vmem:[#allocation8 + $0x48] sm:$0xff] %v1528_v32   ;;  %v641_v15 = vmul.f32 %v1740_v63, %v2463_v58 }
 0x124   :  { %1718 = vrsqrt.f32 %v394_v57 }
 0x125   :  { %v2467_v5 = vpop.eup %1706  ;;  %v1533_v43 = vpack.c.bf16 %v642_v41, %v641_v15  ;;  %1720 = vrsqrt.f32 %v393_v10  ;;  %v300_v54 = vpop.xlane.xlu1 %299 }
 0x126   :  { %v298_v45 = vpop.xlane.xlu0 %297  ;;  %v2469_v42 = vpop.eup %1708  ;;  %v644_v38 = vmul.f32 %v1741_v17, %v2467_v5  ;;  %v396_v16 = vmax.f32 %v300_v54, 1e-16 }
 0x127   :  { %v395_v20 = vmax.f32 %v298_v45, 1e-16  ;;  %1584 = vst [vmem:[#allocation8 + $0x50] sm:$0xff] %v1533_v43   ;;  %v643_v4 = vmul.f32 %v1742_v50, %v2469_v42 }
 0x128   :  { %1722 = vrsqrt.f32 %v396_v16 }
 0x129   :  { %1802 = shalt.err (!%p1799_p0)
}
 0x12a   :  { %s1844_s6 = smov 64   ;;  %s1845_s7 = smov 4   ;;  %v2479_v60 = vpop.eup %1710  ;;  %v1538_v51 = vpack.c.bf16 %v644_v38, %v643_v4  ;;  %1724 = vrsqrt.f32 %v395_v20  ;;  %v880_v32 = vpop.xlane.xlu1 %879  ;;  %v1743_v46 = vld [vmem:[#allocation5 + $0xc8] sm:$0xff]  ;;  %v1744_v57 = vld [vmem:[#allocation5 + $0xc0] sm:$0xff]  ;;  %v1745_v17 = vld [vmem:[#allocation5 + $0xd8] sm:$0xff] }
 0x12b   :  { %1241 = dma.vmem_to_hbm [thread:$0]  %s1236_s1, 2048, %s2831_s2, [#allocation4], %s1844_s6, %s1844_s6, %s1845_s7   ;;  %v878_v49 = vpop.xlane.xlu0 %877  ;;  %v2481_v13 = vpop.eup %1712  ;;  %v646_v41 = vmul.f32 %v1743_v46, %v2479_v60  ;;  %v1746_v16 = vld [vmem:[#allocation5 + $0xd0] sm:$0xff]  ;;  %v1747_v46 = vld [vmem:[#allocation5 + $0xe8] sm:$0xff] }
 0x12c   :  { %943 = vst.msk [vmem:[%s2833_s4 + $0x8] sm:$0xff] %vm941_vm0, %v880_v32  ;;  %942 = vst.msk [vmem:[%s2833_s4] sm:$0xff] %vm941_vm0, %v878_v49  ;;  %v645_v10 = vmul.f32 %v1744_v57, %v2481_v13  ;;  %v1748_v57 = vld [vmem:[#allocation5 + $0xe0] sm:$0xff]  ;;  %s1846_s25 = smov [#allocation8]  }
 0x12d   :  { %1585 = vst [vmem:[#allocation8 + $0x58] sm:$0xff] %v1538_v51   ;;  %v2493_v63 = vpop.eup %1714  ;;  %s1247_s26 = sshll.u32 %s1846_s25, 4  ;;  %s1248_s26 = int_to_ptr.vmem [resolvable:$true] %s1247_s26 }
 0x12e   :  { %v1543_v15 = vpack.c.bf16 %v646_v41, %v645_v10  ;;  %v884_v43 = vpop.xlane.xlu1 %883  ;;  %v2495_v45 = vpop.eup %1716  ;;  %v648_v38 = vmul.f32 %v1745_v17, %v2493_v63  ;;  %s1811_s1 = scalar_lea.vmem %s1248_s26, 2048  ;;  %p1816_p2 = scmp.lt.s32.totalorder %s1248_s26, %s1248_s26 }
 0x12f   :  { %v882_v54 = vpop.xlane.xlu0 %881  ;;  %945 = vst.msk [vmem:[%s2833_s4 + $0x18] sm:$0xff] %vm941_vm0, %v884_v43  ;;  %v647_v20 = vmul.f32 %v1746_v16, %v2495_v45  ;;  %v1749_v16 = vld [vmem:[#allocation5 + $0xf8] sm:$0xff]  ;;  %p1812_p1 = scmp.ne.s32.totalorder %s1248_s26, %s1811_s1  ;;  %p1817_p3 = scmp.lt.s32.totalorder %s1811_s1, %s1811_s1 }
 0x130   :  { %944 = vst.msk [vmem:[%s2833_s4 + $0x10] sm:$0xff] %vm941_vm0, %v882_v54  ;;  %1586 = vst [vmem:[#allocation8 + $0x60] sm:$0xff] %v1543_v15  }
 0x131   :  { %v2507_v50 = vpop.eup %1718  ;;  %v1548_v4 = vpack.c.bf16 %v648_v38, %v647_v20  ;;  %p1818_p4 = por %p1817_p3, %p1816_p2 }
 0x132   :  { %v888_v51 = vpop.xlane.xlu1 %887  ;;  %v2509_v49 = vpop.eup %1720  ;;  %v650_v41 = vmul.f32 %v1747_v46, %v2507_v50 }
 0x133   :  { %v886_v32 = vpop.xlane.xlu0 %885  ;;  %947 = vst.msk [vmem:[%s2833_s4 + $0x28] sm:$0xff] %vm941_vm0, %v888_v51  ;;  %1587 = vst [vmem:[#allocation8 + $0x68] sm:$0xff] %v1548_v4   ;;  %v649_v10 = vmul.f32 %v1748_v57, %v2509_v49  ;;  %v1750_v4 = vld [vmem:[#allocation5 + $0xf0] sm:$0xff]  ;;  %p1819_p5 = pnand %p1818_p4, %p1812_p1 }
 0x134   :  { %946 = vst.msk [vmem:[%s2833_s4 + $0x20] sm:$0xff] %vm941_vm0, %v886_v32 }
 0x135   :  { %v2521_v15 = vpop.eup %1722  ;;  %v1553_v43 = vpack.c.bf16 %v650_v41, %v649_v10 }
 0x136   :  { %2942 = vst [vmem:[#allocation27_spill] sm:$0xff] %v2521_v15  ;;  %v892_v54 = vpop.xlane.xlu1 %891  ;;  %v652_v20 = vmul.f32 %v1749_v16, %v2521_v15 }
 0x137   :  { %v890_v17 = vpop.xlane.xlu0 %889  ;;  %v2523_v38 = vpop.eup %1724  ;;  %949 = vst.msk [vmem:[%s2833_s4 + $0x38] sm:$0xff] %vm941_vm0, %v892_v54  ;;  %1588 = vst [vmem:[#allocation8 + $0x70] sm:$0xff] %v1553_v43  }
 0x138   :  { %948 = vst.msk [vmem:[%s2833_s4 + $0x30] sm:$0xff] %vm941_vm0, %v890_v17  ;;  %v651_v51 = vmul.f32 %v1750_v4, %v2523_v38 }
 0x13a   :  { %v1558_v32 = vpack.c.bf16 %v652_v20, %v651_v51  ;;  %v896_v46 = vpop.xlane.xlu1 %895 }
 0x13b   :  { %v894_v41 = vpop.xlane.xlu0 %893  ;;  %951 = vst.msk [vmem:[%s2833_s4 + $0x48] sm:$0xff] %vm941_vm0, %v896_v46 }
 0x13c   :  { %950 = vst.msk [vmem:[%s2833_s4 + $0x40] sm:$0xff] %vm941_vm0, %v894_v41  ;;  %1589 = vst [vmem:[#allocation8 + $0x78] sm:$0xff] %v1558_v32  }
 0x13d   :  { %1822 = shalt.err (!%p1819_p5)
}
 0x13e   :  { %1253 = dma.vmem_to_hbm [thread:$0]  %s1248_s26, 2048, %s2832_s3, [#allocation9], %s1844_s6, %s1844_s6, %s1845_s7   ;;  %v900_v57 = vpop.xlane.xlu1 %899 }
 0x13f   :  { %v898_v10 = vpop.xlane.xlu0 %897  ;;  %953 = vst.msk [vmem:[%s2833_s4 + $0x58] sm:$0xff] %vm941_vm0, %v900_v57 }
 0x140   :  { %952 = vst.msk [vmem:[%s2833_s4 + $0x50] sm:$0xff] %vm941_vm0, %v898_v10 }
 0x142   :  { %v904_v43 = vpop.xlane.xlu1 %903 }
 0x143   :  { %v902_v54 = vpop.xlane.xlu0 %901  ;;  %955 = vst.msk [vmem:[%s2833_s4 + $0x68] sm:$0xff] %vm941_vm0, %v904_v43 }
 0x144   :  { %954 = vst.msk [vmem:[%s2833_s4 + $0x60] sm:$0xff] %vm941_vm0, %v902_v54 }
 0x146   :  { %v908_v17 = vpop.xlane.xlu1 %907 }
 0x147   :  { %v906_v16 = vpop.xlane.xlu0 %905  ;;  %957 = vst.msk [vmem:[%s2833_s4 + $0x78] sm:$0xff] %vm941_vm0, %v908_v17  ;;  %v2943_v17 = vld [vmem:[#allocation36_spill] sm:$0xff] }
 0x148   :  { %956 = vst.msk [vmem:[%s2833_s4 + $0x70] sm:$0xff] %vm941_vm0, %v906_v16 }
 0x14a   :  { %v912_v20 = vpop.xlane.xlu1 %911 }
 0x14b   :  { %v910_v4 = vpop.xlane.xlu0 %909  ;;  %959 = vst.msk [vmem:[%s2833_s4 + $0x88] sm:$0xff] %vm941_vm0, %v912_v20 }
 0x14c   :  { %958 = vst.msk [vmem:[%s2833_s4 + $0x80] sm:$0xff] %vm941_vm0, %v910_v4 }
 0x14e   :  { %v916_v51 = vpop.xlane.xlu1 %915 }
 0x14f   :  { %v914_v32 = vpop.xlane.xlu0 %913  ;;  %961 = vst.msk [vmem:[%s2833_s4 + $0x98] sm:$0xff] %vm941_vm0, %v916_v51 }
 0x150   :  { %960 = vst.msk [vmem:[%s2833_s4 + $0x90] sm:$0xff] %vm941_vm0, %v914_v32 }
 0x152   :  { %v920_v46 = vpop.xlane.xlu1 %919 }
 0x153   :  { %v918_v41 = vpop.xlane.xlu0 %917  ;;  %963 = vst.msk [vmem:[%s2833_s4 + $0xa8] sm:$0xff] %vm941_vm0, %v920_v46  ;;  %v2944_v46 = vld [vmem:[#allocation35_spill] sm:$0xff] }
 0x154   :  { %962 = vst.msk [vmem:[%s2833_s4 + $0xa0] sm:$0xff] %vm941_vm0, %v918_v41 }
 0x156   :  { %v924_v57 = vpop.xlane.xlu1 %923 }
 0x157   :  { %v922_v10 = vpop.xlane.xlu0 %921  ;;  %965 = vst.msk [vmem:[%s2833_s4 + $0xb8] sm:$0xff] %vm941_vm0, %v924_v57 }
 0x158   :  { %964 = vst.msk [vmem:[%s2833_s4 + $0xb0] sm:$0xff] %vm941_vm0, %v922_v10 }
 0x15a   :  { %v1007_v43 = vpop.xlane.xlu1 %1006 }
 0x15b   :  { %v926_v54 = vpop.xlane.xlu0 %925  ;;  %v1070_v16 = vmul.f32 %v2943_v17, %v1007_v43 }
 0x15c   :  { %966 = vst.msk [vmem:[%s2833_s4 + $0xc0] sm:$0xff] %vm941_vm0, %v926_v54 }
 0x15d   :  { %v1102_v20 = vmul.f32 %v2365_v7, %v1070_v16 }
 0x15e   :  { %v1011_v4 = vpop.xlane.xlu1 %1010 }
 0x15f   :  { %v1009_v51 = vpop.xlane.xlu0 %1008  ;;  %v1134_v32 = vmul.f32 0.5, %v1102_v20  ;;  %v1072_v41 = vmul.f32 %v2944_v46, %v1011_v4  ;;  %v2945_v20 = vld [vmem:[#allocation37_spill] sm:$0xff] }
 0x160   :  { %v1071_v57 = vmul.f32 %v2185_v34, %v1009_v51 }
 0x161   :  { %v1166_v15 = vsub.f32 1.0, %v1134_v32  ;;  %v1104_v10 = vmul.f32 %v2377_v29, %v1072_v41  ;;  %v2946_v41 = vld [vmem:[#allocation38_spill] sm:$0xff] }
 0x162   :  { %v1103_v33 = vmul.f32 %v2363_v1, %v1071_v57  ;;  %v1015_v43 = vpop.xlane.xlu1 %1014 }
 0x163   :  { %v1013_v17 = vpop.xlane.xlu0 %1012  ;;  %1198 = vst.msk [vmem:[%s2834_s5] sm:$0xff] %vm941_vm0, %v1166_v15  ;;  %v1136_v7 = vmul.f32 0.5, %v1104_v10  ;;  %v1074_v16 = vmul.f32 %v2201_v23, %v1015_v43 }
 0x164   :  { %v1135_v54 = vmul.f32 0.5, %v1103_v33  ;;  %v1073_v4 = vmul.f32 %v2945_v20, %v1013_v17  ;;  %v2947_v20 = vld [vmem:[#allocation39_spill] sm:$0xff] }
 0x165   :  { %v1168_v46 = vsub.f32 1.0, %v1136_v7  ;;  %v1106_v51 = vmul.f32 %v2389_v37, %v1074_v16 }
 0x166   :  { %v1167_v34 = vsub.f32 1.0, %v1135_v54  ;;  %v1105_v29 = vmul.f32 %v2375_v55, %v1073_v4  ;;  %v1019_v1 = vpop.xlane.xlu1 %1018 }
 0x167   :  { %v1017_v32 = vpop.xlane.xlu0 %1016  ;;  %1200 = vst.msk [vmem:[%s2834_s5 + $0x10] sm:$0xff] %vm941_vm0, %v1168_v46  ;;  %v1138_v23 = vmul.f32 0.5, %v1106_v51  ;;  %v1076_v15 = vmul.f32 %v2213_v35, %v1019_v1 }
 0x168   :  { %1199 = vst.msk [vmem:[%s2834_s5 + $0x8] sm:$0xff] %vm941_vm0, %v1167_v34  ;;  %v1137_v33 = vmul.f32 0.5, %v1105_v29  ;;  %v1075_v37 = vmul.f32 %v2946_v41, %v1017_v32 }
 0x169   :  { %v1170_v57 = vsub.f32 1.0, %v1138_v23  ;;  %v1108_v10 = vmul.f32 %v2401_v3, %v1076_v15  ;;  %v2948_v23 = vld [vmem:[#allocation40_spill] sm:$0xff] }
 0x16a   :  { %v1169_v55 = vsub.f32 1.0, %v1137_v33  ;;  %v1107_v43 = vmul.f32 %v2387_v36, %v1075_v37  ;;  %v1023_v17 = vpop.xlane.xlu1 %1022 }
 0x16b   :  { %v1021_v7 = vpop.xlane.xlu0 %1020  ;;  %1202 = vst.msk [vmem:[%s2834_s5 + $0x20] sm:$0xff] %vm941_vm0, %v1170_v57  ;;  %v1140_v35 = vmul.f32 0.5, %v1108_v10  ;;  %v1078_v16 = vmul.f32 %v2223_v6, %v1023_v17 }
 0x16c   :  { %1201 = vst.msk [vmem:[%s2834_s5 + $0x18] sm:$0xff] %vm941_vm0, %v1169_v55  ;;  %v1139_v54 = vmul.f32 0.5, %v1107_v43  ;;  %v1077_v3 = vmul.f32 %v2947_v20, %v1021_v7 }
 0x16d   :  { %v1172_v4 = vsub.f32 1.0, %v1140_v35  ;;  %v1110_v46 = vmul.f32 %v2414_v11, %v1078_v16 }
 0x16e   :  { %v1171_v36 = vsub.f32 1.0, %v1139_v54  ;;  %v1109_v34 = vmul.f32 %v2399_v40, %v1077_v3  ;;  %v1027_v51 = vpop.xlane.xlu1 %1026 }
 0x16f   :  { %v1025_v29 = vpop.xlane.xlu0 %1024  ;;  %1204 = vst.msk [vmem:[%s2834_s5 + $0x30] sm:$0xff] %vm941_vm0, %v1172_v4  ;;  %v1142_v6 = vmul.f32 0.5, %v1110_v46  ;;  %v1080_v32 = vmul.f32 %v2233_v62, %v1027_v51 }
 0x170   :  { %1203 = vst.msk [vmem:[%s2834_s5 + $0x28] sm:$0xff] %vm941_vm0, %v1171_v36  ;;  %v1141_v1 = vmul.f32 0.5, %v1109_v34  ;;  %v1079_v11 = vmul.f32 %v2948_v23, %v1025_v29 }
 0x171   :  { %v1174_v33 = vsub.f32 1.0, %v1142_v6  ;;  %v1112_v15 = vmul.f32 %v2425_v8, %v1080_v32 }
 0x172   :  { %v1173_v40 = vsub.f32 1.0, %v1141_v1  ;;  %v1111_v41 = vmul.f32 %v2412_v39, %v1079_v11  ;;  %v1031_v37 = vpop.xlane.xlu1 %1030 }
 0x173   :  { %v1029_v57 = vpop.xlane.xlu0 %1028  ;;  %1206 = vst.msk [vmem:[%s2834_s5 + $0x40] sm:$0xff] %vm941_vm0, %v1174_v33  ;;  %v1144_v62 = vmul.f32 0.5, %v1112_v15  ;;  %v1082_v10 = vmul.f32 %v2245_v53, %v1031_v37 }
 0x174   :  { %1205 = vst.msk [vmem:[%s2834_s5 + $0x38] sm:$0xff] %vm941_vm0, %v1173_v40  ;;  %v1143_v55 = vmul.f32 0.5, %v1111_v41  ;;  %v1081_v8 = vmul.f32 %v2231_v22, %v1029_v57  ;;  %v2949_v57 = vld [vmem:[#allocation23_spill] sm:$0xff] }
 0x175   :  { %v1176_v43 = vsub.f32 1.0, %v1144_v62  ;;  %v1114_v17 = vmul.f32 %v2435_v2, %v1082_v10 }
 0x176   :  { %v1175_v39 = vsub.f32 1.0, %v1143_v55  ;;  %v1113_v7 = vmul.f32 %v2423_v48, %v1081_v8  ;;  %v1035_v35 = vpop.xlane.xlu1 %1034 }
 0x177   :  { %v1033_v54 = vpop.xlane.xlu0 %1032  ;;  %1208 = vst.msk [vmem:[%s2834_s5 + $0x50] sm:$0xff] %vm941_vm0, %v1176_v43  ;;  %v1146_v53 = vmul.f32 0.5, %v1114_v17  ;;  %v1084_v16 = vmul.f32 %v2257_v47, %v1035_v35 }
 0x178   :  { %1207 = vst.msk [vmem:[%s2834_s5 + $0x48] sm:$0xff] %vm941_vm0, %v1175_v39  ;;  %v1145_v22 = vmul.f32 0.5, %v1113_v7  ;;  %v1083_v2 = vmul.f32 %v2243_v14, %v1033_v54  ;;  %v2950_v7 = vld [vmem:[#allocation21_spill] sm:$0xff] }
 0x179   :  { %v1178_v20 = vsub.f32 1.0, %v1146_v53  ;;  %v1116_v3 = vmul.f32 %v2445_v59, %v1084_v16 }
 0x17a   :  { %v1177_v48 = vsub.f32 1.0, %v1145_v22  ;;  %v1115_v4 = vmul.f32 %v2433_v27, %v1083_v2  ;;  %v1039_v36 = vpop.xlane.xlu1 %1038 }
 0x17b   :  { %v1037_v46 = vpop.xlane.xlu0 %1036  ;;  %1210 = vst.msk [vmem:[%s2834_s5 + $0x60] sm:$0xff] %vm941_vm0, %v1178_v20  ;;  %v1148_v47 = vmul.f32 0.5, %v1116_v3  ;;  %v1086_v34 = vmul.f32 %v2269_v0, %v1039_v36 }
 0x17c   :  { %1209 = vst.msk [vmem:[%s2834_s5 + $0x58] sm:$0xff] %vm941_vm0, %v1177_v48  ;;  %v1147_v14 = vmul.f32 0.5, %v1115_v4  ;;  %v1085_v59 = vmul.f32 %v2255_v31, %v1037_v46  ;;  %v2951_v48 = vld [vmem:[#allocation22_spill] sm:$0xff] }
 0x17d   :  { %v1180_v51 = vsub.f32 1.0, %v1148_v47  ;;  %v1118_v29 = vmul.f32 %v2451_v24, %v1086_v34 }
 0x17e   :  { %v1179_v27 = vsub.f32 1.0, %v1147_v14  ;;  %v1117_v6 = vmul.f32 %v2443_v19, %v1085_v59  ;;  %v1043_v1 = vpop.xlane.xlu1 %1042  ;;  %v2952_v59 = vld [vmem:[#allocation24_spill] sm:$0xff] }
 0x17f   :  { %v1041_v32 = vpop.xlane.xlu0 %1040  ;;  %1212 = vst.msk [vmem:[%s2834_s5 + $0x70] sm:$0xff] %vm941_vm0, %v1180_v51  ;;  %v1150_v0 = vmul.f32 0.5, %v1118_v29  ;;  %v1088_v23 = vmul.f32 %v2281_v30, %v1043_v1 }
 0x180   :  { %1211 = vst.msk [vmem:[%s2834_s5 + $0x68] sm:$0xff] %vm941_vm0, %v1179_v27  ;;  %v1149_v31 = vmul.f32 0.5, %v1117_v6  ;;  %v1087_v24 = vmul.f32 %v2267_v56, %v1041_v32 }
 0x181   :  { %v1182_v11 = vsub.f32 1.0, %v1150_v0  ;;  %v1120_v33 = vmul.f32 %v2457_v18, %v1088_v23 }
 0x182   :  { %v1181_v19 = vsub.f32 1.0, %v1149_v31  ;;  %v1119_v40 = vmul.f32 %v2449_v44, %v1087_v24  ;;  %v1047_v15 = vpop.xlane.xlu1 %1046  ;;  %v2953_v31 = vld [vmem:[#allocation14_spill] sm:$0xff] }
 0x183   :  { %v1045_v41 = vpop.xlane.xlu0 %1044  ;;  %1214 = vst.msk [vmem:[%s2834_s5 + $0x80] sm:$0xff] %vm941_vm0, %v1182_v11  ;;  %v1152_v30 = vmul.f32 0.5, %v1120_v33  ;;  %v1090_v37 = vmul.f32 %v2293_v61, %v1047_v15 }
 0x184   :  { %1213 = vst.msk [vmem:[%s2834_s5 + $0x78] sm:$0xff] %vm941_vm0, %v1181_v19  ;;  %v1151_v56 = vmul.f32 0.5, %v1119_v40  ;;  %v1089_v18 = vmul.f32 %v2949_v57, %v1045_v41  ;;  %v2954_v41 = vld [vmem:[#allocation15_spill] sm:$0xff] }
 0x185   :  { %v1184_v62 = vsub.f32 1.0, %v1152_v30  ;;  %v1122_v55 = vmul.f32 %v2463_v58, %v1090_v37 }
 0x186   :  { %v1183_v44 = vsub.f32 1.0, %v1151_v56  ;;  %v1121_v10 = vmul.f32 %v2455_v28, %v1089_v18  ;;  %v1051_v8 = vpop.xlane.xlu1 %1050 }
 0x187   :  { %v1049_v43 = vpop.xlane.xlu0 %1048  ;;  %1216 = vst.msk [vmem:[%s2834_s5 + $0x90] sm:$0xff] %vm941_vm0, %v1184_v62  ;;  %v1154_v61 = vmul.f32 0.5, %v1122_v55  ;;  %v1092_v17 = vmul.f32 %v2305_v9, %v1051_v8 }
 0x188   :  { %1215 = vst.msk [vmem:[%s2834_s5 + $0x88] sm:$0xff] %vm941_vm0, %v1183_v44  ;;  %v1153_v39 = vmul.f32 0.5, %v1121_v10  ;;  %v1091_v58 = vmul.f32 %v2950_v7, %v1049_v43  ;;  %v2956_v10 = vld [vmem:[#allocation27_spill] sm:$0xff] }
 0x189   :  { %v1186_v35 = vsub.f32 1.0, %v1154_v61  ;;  %v1124_v54 = vmul.f32 %v2469_v42, %v1092_v17 }
 0x18a   :  { %v1185_v28 = vsub.f32 1.0, %v1153_v39  ;;  %v1123_v53 = vmul.f32 %v2461_v52, %v1091_v58  ;;  %v1055_v22 = vpop.xlane.xlu1 %1054 }
 0x18b   :  { %v1053_v16 = vpop.xlane.xlu0 %1052  ;;  %1218 = vst.msk [vmem:[%s2834_s5 + $0xa0] sm:$0xff] %vm941_vm0, %v1186_v35  ;;  %v1156_v9 = vmul.f32 0.5, %v1124_v54  ;;  %v1094_v20 = vmul.f32 %v2317_v26, %v1055_v22 }
 0x18c   :  { %1217 = vst.msk [vmem:[%s2834_s5 + $0x98] sm:$0xff] %vm941_vm0, %v1185_v28  ;;  %v1155_v2 = vmul.f32 0.5, %v1123_v53  ;;  %v1093_v42 = vmul.f32 %v2951_v48, %v1053_v16 }
 0x18d   :  { %v1188_v3 = vsub.f32 1.0, %v1156_v9  ;;  %v1126_v4 = vmul.f32 %v2481_v13, %v1094_v20 }
 0x18e   :  { %v1187_v52 = vsub.f32 1.0, %v1155_v2  ;;  %v1125_v36 = vmul.f32 %v2467_v5, %v1093_v42  ;;  %v1059_v46 = vpop.xlane.xlu1 %1058 }
 0x18f   :  { %v1057_v47 = vpop.xlane.xlu0 %1056  ;;  %1220 = vst.msk [vmem:[%s2834_s5 + $0xb0] sm:$0xff] %vm941_vm0, %v1188_v3  ;;  %v1158_v26 = vmul.f32 0.5, %v1126_v4  ;;  %v1096_v34 = vmul.f32 %v2329_v21, %v1059_v46 }
 0x190   :  { %1219 = vst.msk [vmem:[%s2834_s5 + $0xa8] sm:$0xff] %vm941_vm0, %v1187_v52  ;;  %v1157_v14 = vmul.f32 0.5, %v1125_v36  ;;  %v1095_v13 = vmul.f32 %v2952_v59, %v1057_v47 }
 0x191   :  { %v1190_v51 = vsub.f32 1.0, %v1158_v26  ;;  %v1128_v27 = vmul.f32 %v2495_v45, %v1096_v34 }
 0x192   :  { %v1189_v5 = vsub.f32 1.0, %v1157_v14  ;;  %v1127_v29 = vmul.f32 %v2479_v60, %v1095_v13  ;;  %v1063_v6 = vpop.xlane.xlu1 %1062 }
 0x193   :  { %v1061_v1 = vpop.xlane.xlu0 %1060  ;;  %1222 = vst.msk [vmem:[%s2834_s5 + $0xc0] sm:$0xff] %vm941_vm0, %v1190_v51  ;;  %v1160_v21 = vmul.f32 0.5, %v1128_v27  ;;  %v1098_v0 = vmul.f32 %v2341_v25, %v1063_v6 }
 0x194   :  { %1221 = vst.msk [vmem:[%s2834_s5 + $0xb8] sm:$0xff] %vm941_vm0, %v1189_v5  ;;  %v1159_v32 = vmul.f32 0.5, %v1127_v29  ;;  %v1097_v45 = vmul.f32 %v2953_v31, %v1061_v1 }
 0x195   :  { %v1192_v23 = vsub.f32 1.0, %v1160_v21  ;;  %v1130_v24 = vmul.f32 %v2509_v49, %v1098_v0 }
 0x196   :  { %v1191_v60 = vsub.f32 1.0, %v1159_v32  ;;  %v1129_v11 = vmul.f32 %v2493_v63, %v1097_v45  ;;  %v1067_v19 = vpop.xlane.xlu1 %1066 }
 0x197   :  { %v1065_v33 = vpop.xlane.xlu0 %1064  ;;  %1224 = vst.msk [vmem:[%s2834_s5 + $0xd0] sm:$0xff] %vm941_vm0, %v1192_v23  ;;  %v1162_v25 = vmul.f32 0.5, %v1130_v24  ;;  %v1100_v15 = vmul.f32 %v2353_v12, %v1067_v19 }
 0x198   :  { %1223 = vst.msk [vmem:[%s2834_s5 + $0xc8] sm:$0xff] %vm941_vm0, %v1191_v60  ;;  %v1161_v40 = vmul.f32 0.5, %v1129_v11  ;;  %v1099_v49 = vmul.f32 %v2954_v41, %v1065_v33 }
 0x199   :  { %v1194_v30 = vsub.f32 1.0, %v1162_v25  ;;  %v1132_v56 = vmul.f32 %v2523_v38, %v1100_v15 }
 0x19a   :  { %v1193_v63 = vsub.f32 1.0, %v1161_v40  ;;  %v1131_v37 = vmul.f32 %v2507_v50, %v1099_v49  ;;  %v928_v57 = vpop.xlane.xlu1 %927  ;;  %v2955_v50 = vld [vmem:[#allocation16_spill] sm:$0xff] }
 0x19b   :  { %v1069_v18 = vpop.xlane.xlu0 %1068  ;;  %1226 = vst.msk [vmem:[%s2834_s5 + $0xe0] sm:$0xff] %vm941_vm0, %v1194_v30  ;;  %v1164_v12 = vmul.f32 0.5, %v1132_v56  ;;  %967 = vst.msk [vmem:[%s2833_s4 + $0xc8] sm:$0xff] %vm941_vm0, %v928_v57 }
 0x19c   :  { %1225 = vst.msk [vmem:[%s2834_s5 + $0xd8] sm:$0xff] %vm941_vm0, %v1193_v63  ;;  %v1163_v62 = vmul.f32 0.5, %v1131_v37  ;;  %v1101_v38 = vmul.f32 %v2955_v50, %v1069_v18 }
 0x19d   :  { %v1196_v44 = vsub.f32 1.0, %v1164_v12 }
 0x19e   :  { %v1195_v55 = vsub.f32 1.0, %v1163_v62  ;;  %v1133_v8 = vmul.f32 %v2956_v10, %v1101_v38  ;;  %v932_v43 = vpop.xlane.xlu1 %931 }
 0x19f   :  { %v930_v61 = vpop.xlane.xlu0 %929  ;;  %1228 = vst.msk [vmem:[%s2834_s5 + $0xf0] sm:$0xff] %vm941_vm0, %v1196_v44  ;;  %969 = vst.msk [vmem:[%s2833_s4 + $0xd8] sm:$0xff] %vm941_vm0, %v932_v43 }
 0x1a0   :  { %1227 = vst.msk [vmem:[%s2834_s5 + $0xe8] sm:$0xff] %vm941_vm0, %v1195_v55  ;;  %v1165_v39 = vmul.f32 0.5, %v1133_v8  ;;  %968 = vst.msk [vmem:[%s2833_s4 + $0xd0] sm:$0xff] %vm941_vm0, %v930_v61 }
 0x1a2   :  { %v1197_v17 = vsub.f32 1.0, %v1165_v39  ;;  %v936_v7 = vpop.xlane.xlu1 %935 }
 0x1a3   :  { %v934_v58 = vpop.xlane.xlu0 %933  ;;  %971 = vst.msk [vmem:[%s2833_s4 + $0xe8] sm:$0xff] %vm941_vm0, %v936_v7 }
 0x1a4   :  { %1229 = vst.msk [vmem:[%s2834_s5 + $0xf8] sm:$0xff] %vm941_vm0, %v1197_v17  ;;  %970 = vst.msk [vmem:[%s2833_s4 + $0xe0] sm:$0xff] %vm941_vm0, %v934_v58 }
 0x1a6   :  { %v940_v35 = vpop.xlane.xlu1 %939 }
 0x1a7   :  { %v938_v28 = vpop.xlane.xlu0 %937  ;;  %973 = vst.msk [vmem:[%s2833_s4 + $0xf8] sm:$0xff] %vm941_vm0, %v940_v35 }
 0x1a8   :  { %972 = vst.msk [vmem:[%s2833_s4 + $0xf0] sm:$0xff] %vm941_vm0, %v938_v28 }
 0x1a9   :  { %1835 = dma.done.wait [#allocation4], 2048  }
 0x1aa   :  { %1836 = vsyncadd [#allocation4], 4294965248 }
 0x1ab   :  { %1837 = dma.done.wait [#allocation9], 2048  }
 0x1ac   :  { %1838 = vsyncadd [#allocation9], 4294965248 }
 0x1ad   :  { %1268 = vsyncpa [#allocation3], 1 }
 0x1ae   :  { %1269 = vsyncpa [#allocation6], 1 }
 0x1af   :  { %1270 = vsyncpa [#allocation4], 1 }
 0x1b0   :  { %1271 = vsyncpa [#allocation9], 1 }

</bundles_post_ra>
